<compile_context>
chip_gen: v5e
topology: v5e:2x2
jax: 0.10.0
libtpu: 0.0.40
codegen_flags: <defaults>
</compile_context>

<pallas_src>
import functools

import jax
import jax.numpy as jnp
from jax.experimental import pallas as pl
from jax.experimental.pallas import tpu as pltpu

BN_EPS = 1e-5


def _mg_smoothing_kernel(f_ref, u0_ref, wA_ref, wB_ref, fold_ref, g_ref, b_ref,
                         out_ref, *, num_smoothings, N, H, W, C):
    """All smoothing steps fused, everything VMEM resident.

    f_ref, u0_ref : (N*H, W*C)        lane-dense rhs / initial iterate (f32)
    wA_ref, wB_ref: (3*W*C, W*C)      K-stacked banded conv matrices (bf16)
    fold_ref      : (W*C, W*C)        channel-fold matrix (f32)
    g_ref, b_ref  : (2*num_smoothings, W*C)  pre-tiled BN affine params (f32)
    out_ref       : (N*H, W*C)
    """
    WC = W * C
    M = N * H
    inv_count = 1.0 / float(N * H * W)          # BN samples per channel

    f = f_ref[...]                               # (M, WC)
    u = u0_ref[...]                              # (M, WC), loop-carried value

    # One-time setup: per-image vertical boundary masks (h == 0 / h == H-1).
    h_idx = jax.lax.broadcasted_iota(jnp.int32, (M, WC), 0) % H
    top = h_idx == 0
    bot = h_idx == (H - 1)
    zrow = jnp.zeros((1, WC), jnp.float32)

    def conv3x3(x, w_ref):
        # "same" 3x3 conv as ONE bf16 MXU dot with K = 3*WC.
        # slab lanes = [row h-1 | row h | row h+1]; w_ref = [wb0; wb1; wb2],
        # where wb_dh is the banded (WC, WC) matrix of filter row dh.
        # Horizontal zero padding lives in the band; vertical via the masks.
        up = jnp.where(top, 0.0, jnp.concatenate([zrow, x[:M - 1, :]], axis=0))
        dn = jnp.where(bot, 0.0, jnp.concatenate([x[1:, :], zrow], axis=0))
        xx = jnp.concatenate([up.astype(jnp.bfloat16),
                              x.astype(jnp.bfloat16),
                              dn.astype(jnp.bfloat16)], axis=1)   # (M, 3*WC)
        return jnp.dot(xx, w_ref[...], preferred_element_type=jnp.float32)

    def bn_relu(x, g, b):
        # training-mode BatchNorm2d + ReLU; channel of lane l is l % C.
        # sum(x) and sum(x*x) feed a single f32 channel-fold matmul that both
        # reduces over the W lane-repeats and re-broadcasts per-channel stats
        # back into the lane-dense layout.
        s = jnp.concatenate([jnp.sum(x, axis=0, keepdims=True),
                             jnp.sum(x * x, axis=0, keepdims=True)], axis=0)
        stats = jnp.dot(s, fold_ref[...],
                        preferred_element_type=jnp.float32) * inv_count
        mean = stats[0:1, :]
        var = stats[1:2, :] - mean * mean          # biased var, E[x^2] - m^2
        y = (x - mean) * jax.lax.rsqrt(var + BN_EPS) * g + b
        return jnp.maximum(y, 0.0)

    for i in range(num_smoothings):                # static -> unrolled
        g1 = g_ref[pl.ds(2 * i, 1), :]
        b1 = b_ref[pl.ds(2 * i, 1), :]
        g2 = g_ref[pl.ds(2 * i + 1, 1), :]
        b2 = b_ref[pl.ds(2 * i + 1, 1), :]
        r = bn_relu(f - conv3x3(u, wA_ref), g1, b1)    # r = relu(bn1(f - A u))
        u = bn_relu(conv3x3(r, wB_ref), g2, b2) + u    # u = relu(bn2(B r)) + u

    out_ref[...] = u


def _banded_conv_weights(w_hwio, W, C):
    """(3,3,Cin,Cout) HWIO -> (3*W*C, W*C) bf16 K-stacked banded matrices.

    Block dh, entry [w_in*C + ci, w_out*C + co] = w[dh, w_in - w_out + 1, ci, co]
    when that horizontal tap exists, else 0 — which *is* "same" zero padding,
    so no extra pad lanes are needed.
    """
    WC = W * C
    l = jnp.arange(WC)
    m = jnp.arange(WC)
    w_in, ci = l // C, l % C
    w_out, co = m // C, m % C
    dw = w_in[:, None] - w_out[None, :] + 1            # filter column index
    valid = (dw >= 0) & (dw <= 2)
    band = w_hwio[:, jnp.clip(dw, 0, 2), ci[:, None], co[None, :]]  # (3,WC,WC)
    band = jnp.where(valid[None, :, :], band, 0.0)
    return band.reshape(3 * WC, WC).astype(jnp.bfloat16)


@functools.partial(jax.jit, static_argnames=("num_smoothings",))
def mg_smoothing(f_nchw, u_nchw, wA_hwio, wB_hwio, gammas, betas, *,
                 num_smoothings):
    """Equivalent of BaseMgBlock.smoothing(f, u) with shared A/B convs."""
    N, C, H, W = f_nchw.shape
    WC = W * C
    if WC % 128 != 0:
        raise ValueError("lane-dense layout needs W*C to be a multiple of 128")
    # layout glue: NCHW (PyTorch) -> NHWC -> lane-dense (N*H, W*C)
    f = jnp.transpose(f_nchw, (0, 2, 3, 1)).reshape(N * H, WC).astype(jnp.float32)
    u = jnp.transpose(u_nchw, (0, 2, 3, 1)).reshape(N * H, WC).astype(jnp.float32)
    wA = _banded_conv_weights(wA_hwio, W, C)
    wB = _banded_conv_weights(wB_hwio, W, C)
    # channel-fold matrix: fold[l, m] = 1 iff lanes l and m hold the same chan.
    lane = jnp.arange(WC)
    fold = (lane[:, None] % C == lane[None, :] % C).astype(jnp.float32)
    # BN affine params pre-tiled to lane-dense layout (lane w*C+c -> channel c)
    g = jnp.stack([jnp.tile(x.reshape(-1), W) for x in gammas]).astype(jnp.float32)
    b = jnp.stack([jnp.tile(x.reshape(-1), W) for x in betas]).astype(jnp.float32)

    flops_per_step = (2 * 2 * (N * H) * (3 * WC) * WC    # two conv dots
                      + 2 * 2 * 2 * WC * WC)             # two fold dots
    bytes_accessed = (4 * (3 * N * H * WC + WC * WC + 4 * num_smoothings * WC)
                      + 2 * 2 * 3 * WC * WC)             # bf16 banded weights
    vmem = pl.BlockSpec(memory_space=pltpu.MemorySpace.VMEM)
    out = pl.pallas_call(
        functools.partial(_mg_smoothing_kernel, num_smoothings=num_smoothings,
                          N=N, H=H, W=W, C=C),
        out_shape=jax.ShapeDtypeStruct((N * H, WC), jnp.float32),
        in_specs=[vmem] * 7,
        out_specs=vmem,
        compiler_params=pltpu.CompilerParams(
            # whole-problem-resident design: declare the budget; must stay
            # under v7x's 64 MiB physical VMEM (static need here < 1 MiB).
            vmem_limit_bytes=32 * 1024 * 1024),
        cost_estimate=pl.CostEstimate(
            flops=num_smoothings * flops_per_step,
            transcendentals=num_smoothings * 2 * WC,
            bytes_accessed=bytes_accessed),
    )(f, u, wA, wB, fold, g, b)
    return jnp.transpose(out.reshape(N, H, W, C), (0, 3, 1, 2))   # back to NCHW


def _reference(f_nchw, u_nchw, wA, wB, gammas, betas, num_smoothings):
    """Pure-JAX f32 reference of the smoothing loop (NHWC internally)."""
    f = jnp.transpose(f_nchw, (0, 2, 3, 1))
    u = jnp.transpose(u_nchw, (0, 2, 3, 1))

    def conv(x, w):
        return jax.lax.conv_general_dilated(
            x, w, (1, 1), "SAME", dimension_numbers=("NHWC", "HWIO", "NHWC"))

    def bn(x, g, b):
        mean = jnp.mean(x, axis=(0, 1, 2), keepdims=True)
        var = jnp.mean(jnp.square(x - mean), axis=(0, 1, 2), keepdims=True)
        return ((x - mean) * jax.lax.rsqrt(var + BN_EPS)
                * g.reshape(1, 1, 1, -1) + b.reshape(1, 1, 1, -1))

    for i in range(num_smoothings):
        r = jnp.maximum(bn(f - conv(u, wA), gammas[2 * i], betas[2 * i]), 0.0)
        u = jnp.maximum(bn(conv(r, wB), gammas[2 * i + 1], betas[2 * i + 1]),
                        0.0) + u
    return jnp.transpose(u, (0, 3, 1, 2))


if __name__ == "__main__":
    N, C, H, W = 2, 8, 16, 16          # W*C == 128 -> lane-dense layout
    num_smoothings = 2

    key = jax.random.PRNGKey(0)
    kf, ku, ka, kb = jax.random.split(key, 4)

    f = jax.random.normal(kf, (N, C, H, W), jnp.float32)          # rhs
    u0 = jax.random.normal(ku, (N, C, H, W), jnp.float32)         # iterate
    wA = 0.1 * jax.random.normal(ka, (3, 3, C, C), jnp.float32)   # HWIO, shared
    wB = 0.1 * jax.random.normal(kb, (3, 3, C, C), jnp.float32)
    # fresh BatchNorm2d pairs per smoothing step: gamma=1, beta=0
    gammas = tuple(jnp.ones((C,), jnp.float32) for _ in range(2 * num_smoothings))
    betas = tuple(jnp.zeros((C,), jnp.float32) for _ in range(2 * num_smoothings))

    out = mg_smoothing(f, u0, wA, wB, gammas, betas,
                       num_smoothings=num_smoothings)
    jax.block_until_ready(out)
    assert out.shape == (N, C, H, W) and out.dtype == jnp.float32

    ref = _reference(f, u0, wA, wB, gammas, betas, num_smoothings)
    # Tolerance reflects bf16 MXU conv operands (accumulation in f32) vs the
    # pure-f32 reference.
    assert jnp.allclose(out, ref, atol=2e-2, rtol=2e-2), \
        float(jnp.max(jnp.abs(out - ref)))
    print("KERNEL_OK")
</pallas_src>

<mosaic_0001>
module attributes {stable_mosaic.version = 11 : i64} {
  func.func @_mg_smoothing_kernel(%arg0: memref<32x128xf32, #tpu.memory_space<vmem>>, %arg1: memref<32x128xf32, #tpu.memory_space<vmem>>, %arg2: memref<384x128xbf16, #tpu.memory_space<vmem>>, %arg3: memref<384x128xbf16, #tpu.memory_space<vmem>>, %arg4: memref<128x128xf32, #tpu.memory_space<vmem>>, %arg5: memref<4x128xf32, #tpu.memory_space<vmem>>, %arg6: memref<4x128xf32, #tpu.memory_space<vmem>>, %arg7: memref<32x128xf32, #tpu.memory_space<vmem>>) attributes {dimension_semantics = [], scalar_prefetch = 0 : i64, scratch_operands = 0 : i64, tpu.core_type = #tpu.core_type<tc>} {
    %c0 = arith.constant 0 : index
    %c0_0 = arith.constant 0 : index
    %0 = vector.load %arg0[%c0, %c0_0] : memref<32x128xf32, #tpu.memory_space<vmem>>, vector<32x128xf32>
    %c0_1 = arith.constant 0 : index
    %c0_2 = arith.constant 0 : index
    %1 = vector.load %arg1[%c0_1, %c0_2] : memref<32x128xf32, #tpu.memory_space<vmem>>, vector<32x128xf32>
    %2 = tpu.iota {dimensions = array<i32: 0>} : vector<32x128xi32>
    %c16_i32 = arith.constant 16 : i32
    %c0_i32 = arith.constant 0 : i32
    %3 = arith.cmpi eq, %c16_i32, %c0_i32 : i32
    %c1_i32 = arith.constant 1 : i32
    %4 = arith.select %3, %c1_i32, %c16_i32 : i32
    %5 = vector.broadcast %4 : i32 to vector<32x128xi32>
    %6 = arith.remsi %2, %5 : vector<32x128xi32>
    %c0_i32_3 = arith.constant 0 : i32
    %7 = vector.broadcast %c0_i32_3 : i32 to vector<32x128xi32>
    %8 = arith.cmpi ne, %6, %7 : vector<32x128xi32>
    %c0_i32_4 = arith.constant 0 : i32
    %9 = vector.broadcast %c0_i32_4 : i32 to vector<32x128xi32>
    %10 = arith.cmpi slt, %6, %9 : vector<32x128xi32>
    %c0_i32_5 = arith.constant 0 : i32
    %11 = arith.cmpi slt, %4, %c0_i32_5 : i32
    %12 = vector.broadcast %11 : i1 to vector<32x128xi1>
    %13 = vector.broadcast %12 : vector<32x128xi1> to vector<32x128xi1>
    %14 = arith.xori %10, %13 : vector<32x128xi1>
    %15 = arith.andi %14, %8 : vector<32x128xi1>
    %16 = vector.broadcast %4 : i32 to vector<32x128xi32>
    %17 = arith.addi %6, %16 : vector<32x128xi32>
    %18 = arith.select %15, %17, %6 : vector<32x128xi1>, vector<32x128xi32>
    %c0_i32_6 = arith.constant 0 : i32
    %19 = vector.broadcast %c0_i32_6 : i32 to vector<32x128xi32>
    %20 = arith.cmpi eq, %18, %19 : vector<32x128xi32>
    %c15_i32 = arith.constant 15 : i32
    %21 = vector.broadcast %c15_i32 : i32 to vector<32x128xi32>
    %22 = arith.cmpi eq, %18, %21 : vector<32x128xi32>
    %cst = arith.constant 0.000000e+00 : f32
    %23 = vector.broadcast %cst : f32 to vector<1x128xf32>
    %c0_7 = arith.constant 0 : index
    %c0_8 = arith.constant 0 : index
    %24 = vector.load %arg5[%c0_7, %c0_8] : memref<4x128xf32, #tpu.memory_space<vmem>>, vector<1x128xf32>
    %c0_9 = arith.constant 0 : index
    %c0_10 = arith.constant 0 : index
    %25 = vector.load %arg6[%c0_9, %c0_10] : memref<4x128xf32, #tpu.memory_space<vmem>>, vector<1x128xf32>
    %c1 = arith.constant 1 : index
    %c0_11 = arith.constant 0 : index
    %26 = vector.load %arg5[%c1, %c0_11] : memref<4x128xf32, #tpu.memory_space<vmem>>, vector<1x128xf32>
    %c1_12 = arith.constant 1 : index
    %c0_13 = arith.constant 0 : index
    %27 = vector.load %arg6[%c1_12, %c0_13] : memref<4x128xf32, #tpu.memory_space<vmem>>, vector<1x128xf32>
    %28 = vector.extract_strided_slice %1 {offsets = [0, 0], sizes = [31, 128], strides = [1, 1]} : vector<32x128xf32> to vector<31x128xf32>
    %29 = tpu.concatenate %23, %28 in 0 : vector<1x128xf32>, vector<31x128xf32> -> vector<32x128xf32>
    %cst_14 = arith.constant 0.000000e+00 : f32
    %30 = vector.broadcast %cst_14 : f32 to vector<32x128xf32>
    %31 = arith.select %20, %30, %29 : vector<32x128xi1>, vector<32x128xf32>
    %32 = vector.extract_strided_slice %1 {offsets = [1, 0], sizes = [31, 128], strides = [1, 1]} : vector<32x128xf32> to vector<31x128xf32>
    %33 = tpu.concatenate %32, %23 in 0 : vector<31x128xf32>, vector<1x128xf32> -> vector<32x128xf32>
    %cst_15 = arith.constant 0.000000e+00 : f32
    %34 = vector.broadcast %cst_15 : f32 to vector<32x128xf32>
    %35 = arith.select %22, %34, %33 : vector<32x128xi1>, vector<32x128xf32>
    %36 = arith.truncf %31 : vector<32x128xf32> to vector<32x128xbf16>
    %37 = arith.truncf %1 : vector<32x128xf32> to vector<32x128xbf16>
    %38 = arith.truncf %35 : vector<32x128xf32> to vector<32x128xbf16>
    %39 = tpu.concatenate %36, %37, %38 in 1 : vector<32x128xbf16>, vector<32x128xbf16>, vector<32x128xbf16> -> vector<32x384xbf16>
    %c0_16 = arith.constant 0 : index
    %c0_17 = arith.constant 0 : index
    %40 = vector.load %arg2[%c0_16, %c0_17] : memref<384x128xbf16, #tpu.memory_space<vmem>>, vector<384x128xbf16>
    %cst_18 = arith.constant dense<0.000000e+00> : vector<32x128xf32>
    %41 = tpu.matmul %39, %40, %cst_18 {dimension_numbers = #tpu.dot_dimension_numbers<[1], [0], [0], [1], [0, 0, 1, 1], [], []>} : vector<32x384xbf16>, vector<384x128xbf16>, vector<32x128xf32> -> vector<32x128xf32>
    %42 = arith.subf %0, %41 : vector<32x128xf32>
    %cst_19 = arith.constant dense<0.000000e+00> : vector<128xf32>
    %43 = vector.multi_reduction <add>, %42, %cst_19 [0] : vector<32x128xf32> to vector<128xf32>
    %44 = vector.shape_cast %43 : vector<128xf32> to vector<1x128xf32>
    %45 = arith.mulf %42, %42 : vector<32x128xf32>
    %cst_20 = arith.constant dense<0.000000e+00> : vector<128xf32>
    %46 = vector.multi_reduction <add>, %45, %cst_20 [0] : vector<32x128xf32> to vector<128xf32>
    %47 = vector.shape_cast %46 : vector<128xf32> to vector<1x128xf32>
    %48 = tpu.concatenate %44, %47 in 0 : vector<1x128xf32>, vector<1x128xf32> -> vector<2x128xf32>
    %c0_21 = arith.constant 0 : index
    %c0_22 = arith.constant 0 : index
    %49 = vector.load %arg4[%c0_21, %c0_22] : memref<128x128xf32, #tpu.memory_space<vmem>>, vector<128x128xf32>
    %cst_23 = arith.constant dense<0.000000e+00> : vector<2x128xf32>
    %50 = tpu.matmul %48, %49, %cst_23 {dimension_numbers = #tpu.dot_dimension_numbers<[1], [0], [0], [1], [0, 0, 1, 1], [], []>} : vector<2x128xf32>, vector<128x128xf32>, vector<2x128xf32> -> vector<2x128xf32>
    %cst_24 = arith.constant 0.001953125 : f32
    %51 = vector.broadcast %cst_24 : f32 to vector<2x128xf32>
    %52 = arith.mulf %50, %51 : vector<2x128xf32>
    %53 = vector.extract_strided_slice %52 {offsets = [0, 0], sizes = [1, 128], strides = [1, 1]} : vector<2x128xf32> to vector<1x128xf32>
    %54 = vector.extract_strided_slice %52 {offsets = [1, 0], sizes = [1, 128], strides = [1, 1]} : vector<2x128xf32> to vector<1x128xf32>
    %55 = arith.mulf %53, %53 : vector<1x128xf32>
    %56 = arith.subf %54, %55 : vector<1x128xf32>
    %57 = vector.broadcast %53 : vector<1x128xf32> to vector<32x128xf32>
    %58 = arith.subf %42, %57 : vector<32x128xf32>
    %cst_25 = arith.constant 9.99999974E-6 : f32
    %59 = vector.broadcast %cst_25 : f32 to vector<1x128xf32>
    %60 = arith.addf %56, %59 : vector<1x128xf32>
    %61 = math.rsqrt %60 : vector<1x128xf32>
    %62 = vector.broadcast %61 : vector<1x128xf32> to vector<32x128xf32>
    %63 = arith.mulf %58, %62 : vector<32x128xf32>
    %64 = vector.broadcast %24 : vector<1x128xf32> to vector<32x128xf32>
    %65 = arith.mulf %63, %64 : vector<32x128xf32>
    %66 = vector.broadcast %25 : vector<1x128xf32> to vector<32x128xf32>
    %67 = arith.addf %65, %66 : vector<32x128xf32>
    %cst_26 = arith.constant 0.000000e+00 : f32
    %68 = vector.broadcast %cst_26 : f32 to vector<32x128xf32>
    %69 = arith.maximumf %67, %68 : vector<32x128xf32>
    %70 = vector.extract_strided_slice %69 {offsets = [0, 0], sizes = [31, 128], strides = [1, 1]} : vector<32x128xf32> to vector<31x128xf32>
    %71 = tpu.concatenate %23, %70 in 0 : vector<1x128xf32>, vector<31x128xf32> -> vector<32x128xf32>
    %cst_27 = arith.constant 0.000000e+00 : f32
    %72 = vector.broadcast %cst_27 : f32 to vector<32x128xf32>
    %73 = arith.select %20, %72, %71 : vector<32x128xi1>, vector<32x128xf32>
    %74 = vector.extract_strided_slice %69 {offsets = [1, 0], sizes = [31, 128], strides = [1, 1]} : vector<32x128xf32> to vector<31x128xf32>
    %75 = tpu.concatenate %74, %23 in 0 : vector<31x128xf32>, vector<1x128xf32> -> vector<32x128xf32>
    %cst_28 = arith.constant 0.000000e+00 : f32
    %76 = vector.broadcast %cst_28 : f32 to vector<32x128xf32>
    %77 = arith.select %22, %76, %75 : vector<32x128xi1>, vector<32x128xf32>
    %78 = arith.truncf %73 : vector<32x128xf32> to vector<32x128xbf16>
    %79 = arith.truncf %69 : vector<32x128xf32> to vector<32x128xbf16>
    %80 = arith.truncf %77 : vector<32x128xf32> to vector<32x128xbf16>
    %81 = tpu.concatenate %78, %79, %80 in 1 : vector<32x128xbf16>, vector<32x128xbf16>, vector<32x128xbf16> -> vector<32x384xbf16>
    %c0_29 = arith.constant 0 : index
    %c0_30 = arith.constant 0 : index
    %82 = vector.load %arg3[%c0_29, %c0_30] : memref<384x128xbf16, #tpu.memory_space<vmem>>, vector<384x128xbf16>
    %cst_31 = arith.constant dense<0.000000e+00> : vector<32x128xf32>
    %83 = tpu.matmul %81, %82, %cst_31 {dimension_numbers = #tpu.dot_dimension_numbers<[1], [0], [0], [1], [0, 0, 1, 1], [], []>} : vector<32x384xbf16>, vector<384x128xbf16>, vector<32x128xf32> -> vector<32x128xf32>
    %cst_32 = arith.constant dense<0.000000e+00> : vector<128xf32>
    %84 = vector.multi_reduction <add>, %83, %cst_32 [0] : vector<32x128xf32> to vector<128xf32>
    %85 = vector.shape_cast %84 : vector<128xf32> to vector<1x128xf32>
    %86 = arith.mulf %83, %83 : vector<32x128xf32>
    %cst_33 = arith.constant dense<0.000000e+00> : vector<128xf32>
    %87 = vector.multi_reduction <add>, %86, %cst_33 [0] : vector<32x128xf32> to vector<128xf32>
    %88 = vector.shape_cast %87 : vector<128xf32> to vector<1x128xf32>
    %89 = tpu.concatenate %85, %88 in 0 : vector<1x128xf32>, vector<1x128xf32> -> vector<2x128xf32>
    %c0_34 = arith.constant 0 : index
    %c0_35 = arith.constant 0 : index
    %90 = vector.load %arg4[%c0_34, %c0_35] : memref<128x128xf32, #tpu.memory_space<vmem>>, vector<128x128xf32>
    %cst_36 = arith.constant dense<0.000000e+00> : vector<2x128xf32>
    %91 = tpu.matmul %89, %90, %cst_36 {dimension_numbers = #tpu.dot_dimension_numbers<[1], [0], [0], [1], [0, 0, 1, 1], [], []>} : vector<2x128xf32>, vector<128x128xf32>, vector<2x128xf32> -> vector<2x128xf32>
    %cst_37 = arith.constant 0.001953125 : f32
    %92 = vector.broadcast %cst_37 : f32 to vector<2x128xf32>
    %93 = arith.mulf %91, %92 : vector<2x128xf32>
    %94 = vector.extract_strided_slice %93 {offsets = [0, 0], sizes = [1, 128], strides = [1, 1]} : vector<2x128xf32> to vector<1x128xf32>
    %95 = vector.extract_strided_slice %93 {offsets = [1, 0], sizes = [1, 128], strides = [1, 1]} : vector<2x128xf32> to vector<1x128xf32>
    %96 = arith.mulf %94, %94 : vector<1x128xf32>
    %97 = arith.subf %95, %96 : vector<1x128xf32>
    %98 = vector.broadcast %94 : vector<1x128xf32> to vector<32x128xf32>
    %99 = arith.subf %83, %98 : vector<32x128xf32>
    %cst_38 = arith.constant 9.99999974E-6 : f32
    %100 = vector.broadcast %cst_38 : f32 to vector<1x128xf32>
    %101 = arith.addf %97, %100 : vector<1x128xf32>
    %102 = math.rsqrt %101 : vector<1x128xf32>
    %103 = vector.broadcast %102 : vector<1x128xf32> to vector<32x128xf32>
    %104 = arith.mulf %99, %103 : vector<32x128xf32>
    %105 = vector.broadcast %26 : vector<1x128xf32> to vector<32x128xf32>
    %106 = arith.mulf %104, %105 : vector<32x128xf32>
    %107 = vector.broadcast %27 : vector<1x128xf32> to vector<32x128xf32>
    %108 = arith.addf %106, %107 : vector<32x128xf32>
    %cst_39 = arith.constant 0.000000e+00 : f32
    %109 = vector.broadcast %cst_39 : f32 to vector<32x128xf32>
    %110 = arith.maximumf %108, %109 : vector<32x128xf32>
    %111 = arith.addf %110, %1 : vector<32x128xf32>
    %c2 = arith.constant 2 : index
    %c0_40 = arith.constant 0 : index
    %112 = vector.load %arg5[%c2, %c0_40] : memref<4x128xf32, #tpu.memory_space<vmem>>, vector<1x128xf32>
    %c2_41 = arith.constant 2 : index
    %c0_42 = arith.constant 0 : index
    %113 = vector.load %arg6[%c2_41, %c0_42] : memref<4x128xf32, #tpu.memory_space<vmem>>, vector<1x128xf32>
    %c3 = arith.constant 3 : index
    %c0_43 = arith.constant 0 : index
    %114 = vector.load %arg5[%c3, %c0_43] : memref<4x128xf32, #tpu.memory_space<vmem>>, vector<1x128xf32>
    %c3_44 = arith.constant 3 : index
    %c0_45 = arith.constant 0 : index
    %115 = vector.load %arg6[%c3_44, %c0_45] : memref<4x128xf32, #tpu.memory_space<vmem>>, vector<1x128xf32>
    %116 = vector.extract_strided_slice %111 {offsets = [0, 0], sizes = [31, 128], strides = [1, 1]} : vector<32x128xf32> to vector<31x128xf32>
    %117 = tpu.concatenate %23, %116 in 0 : vector<1x128xf32>, vector<31x128xf32> -> vector<32x128xf32>
    %cst_46 = arith.constant 0.000000e+00 : f32
    %118 = vector.broadcast %cst_46 : f32 to vector<32x128xf32>
    %119 = arith.select %20, %118, %117 : vector<32x128xi1>, vector<32x128xf32>
    %120 = vector.extract_strided_slice %111 {offsets = [1, 0], sizes = [31, 128], strides = [1, 1]} : vector<32x128xf32> to vector<31x128xf32>
    %121 = tpu.concatenate %120, %23 in 0 : vector<31x128xf32>, vector<1x128xf32> -> vector<32x128xf32>
    %cst_47 = arith.constant 0.000000e+00 : f32
    %122 = vector.broadcast %cst_47 : f32 to vector<32x128xf32>
    %123 = arith.select %22, %122, %121 : vector<32x128xi1>, vector<32x128xf32>
    %124 = arith.truncf %119 : vector<32x128xf32> to vector<32x128xbf16>
    %125 = arith.truncf %111 : vector<32x128xf32> to vector<32x128xbf16>
    %126 = arith.truncf %123 : vector<32x128xf32> to vector<32x128xbf16>
    %127 = tpu.concatenate %124, %125, %126 in 1 : vector<32x128xbf16>, vector<32x128xbf16>, vector<32x128xbf16> -> vector<32x384xbf16>
    %c0_48 = arith.constant 0 : index
    %c0_49 = arith.constant 0 : index
    %128 = vector.load %arg2[%c0_48, %c0_49] : memref<384x128xbf16, #tpu.memory_space<vmem>>, vector<384x128xbf16>
    %cst_50 = arith.constant dense<0.000000e+00> : vector<32x128xf32>
    %129 = tpu.matmul %127, %128, %cst_50 {dimension_numbers = #tpu.dot_dimension_numbers<[1], [0], [0], [1], [0, 0, 1, 1], [], []>} : vector<32x384xbf16>, vector<384x128xbf16>, vector<32x128xf32> -> vector<32x128xf32>
    %130 = arith.subf %0, %129 : vector<32x128xf32>
    %cst_51 = arith.constant dense<0.000000e+00> : vector<128xf32>
    %131 = vector.multi_reduction <add>, %130, %cst_51 [0] : vector<32x128xf32> to vector<128xf32>
    %132 = vector.shape_cast %131 : vector<128xf32> to vector<1x128xf32>
    %133 = arith.mulf %130, %130 : vector<32x128xf32>
    %cst_52 = arith.constant dense<0.000000e+00> : vector<128xf32>
    %134 = vector.multi_reduction <add>, %133, %cst_52 [0] : vector<32x128xf32> to vector<128xf32>
    %135 = vector.shape_cast %134 : vector<128xf32> to vector<1x128xf32>
    %136 = tpu.concatenate %132, %135 in 0 : vector<1x128xf32>, vector<1x128xf32> -> vector<2x128xf32>
    %c0_53 = arith.constant 0 : index
    %c0_54 = arith.constant 0 : index
    %137 = vector.load %arg4[%c0_53, %c0_54] : memref<128x128xf32, #tpu.memory_space<vmem>>, vector<128x128xf32>
    %cst_55 = arith.constant dense<0.000000e+00> : vector<2x128xf32>
    %138 = tpu.matmul %136, %137, %cst_55 {dimension_numbers = #tpu.dot_dimension_numbers<[1], [0], [0], [1], [0, 0, 1, 1], [], []>} : vector<2x128xf32>, vector<128x128xf32>, vector<2x128xf32> -> vector<2x128xf32>
    %cst_56 = arith.constant 0.001953125 : f32
    %139 = vector.broadcast %cst_56 : f32 to vector<2x128xf32>
    %140 = arith.mulf %138, %139 : vector<2x128xf32>
    %141 = vector.extract_strided_slice %140 {offsets = [0, 0], sizes = [1, 128], strides = [1, 1]} : vector<2x128xf32> to vector<1x128xf32>
    %142 = vector.extract_strided_slice %140 {offsets = [1, 0], sizes = [1, 128], strides = [1, 1]} : vector<2x128xf32> to vector<1x128xf32>
    %143 = arith.mulf %141, %141 : vector<1x128xf32>
    %144 = arith.subf %142, %143 : vector<1x128xf32>
    %145 = vector.broadcast %141 : vector<1x128xf32> to vector<32x128xf32>
    %146 = arith.subf %130, %145 : vector<32x128xf32>
    %cst_57 = arith.constant 9.99999974E-6 : f32
    %147 = vector.broadcast %cst_57 : f32 to vector<1x128xf32>
    %148 = arith.addf %144, %147 : vector<1x128xf32>
    %149 = math.rsqrt %148 : vector<1x128xf32>
    %150 = vector.broadcast %149 : vector<1x128xf32> to vector<32x128xf32>
    %151 = arith.mulf %146, %150 : vector<32x128xf32>
    %152 = vector.broadcast %112 : vector<1x128xf32> to vector<32x128xf32>
    %153 = arith.mulf %151, %152 : vector<32x128xf32>
    %154 = vector.broadcast %113 : vector<1x128xf32> to vector<32x128xf32>
    %155 = arith.addf %153, %154 : vector<32x128xf32>
    %cst_58 = arith.constant 0.000000e+00 : f32
    %156 = vector.broadcast %cst_58 : f32 to vector<32x128xf32>
    %157 = arith.maximumf %155, %156 : vector<32x128xf32>
    %158 = vector.extract_strided_slice %157 {offsets = [0, 0], sizes = [31, 128], strides = [1, 1]} : vector<32x128xf32> to vector<31x128xf32>
    %159 = tpu.concatenate %23, %158 in 0 : vector<1x128xf32>, vector<31x128xf32> -> vector<32x128xf32>
    %cst_59 = arith.constant 0.000000e+00 : f32
    %160 = vector.broadcast %cst_59 : f32 to vector<32x128xf32>
    %161 = arith.select %20, %160, %159 : vector<32x128xi1>, vector<32x128xf32>
    %162 = vector.extract_strided_slice %157 {offsets = [1, 0], sizes = [31, 128], strides = [1, 1]} : vector<32x128xf32> to vector<31x128xf32>
    %163 = tpu.concatenate %162, %23 in 0 : vector<31x128xf32>, vector<1x128xf32> -> vector<32x128xf32>
    %cst_60 = arith.constant 0.000000e+00 : f32
    %164 = vector.broadcast %cst_60 : f32 to vector<32x128xf32>
    %165 = arith.select %22, %164, %163 : vector<32x128xi1>, vector<32x128xf32>
    %166 = arith.truncf %161 : vector<32x128xf32> to vector<32x128xbf16>
    %167 = arith.truncf %157 : vector<32x128xf32> to vector<32x128xbf16>
    %168 = arith.truncf %165 : vector<32x128xf32> to vector<32x128xbf16>
    %169 = tpu.concatenate %166, %167, %168 in 1 : vector<32x128xbf16>, vector<32x128xbf16>, vector<32x128xbf16> -> vector<32x384xbf16>
    %c0_61 = arith.constant 0 : index
    %c0_62 = arith.constant 0 : index
    %170 = vector.load %arg3[%c0_61, %c0_62] : memref<384x128xbf16, #tpu.memory_space<vmem>>, vector<384x128xbf16>
    %cst_63 = arith.constant dense<0.000000e+00> : vector<32x128xf32>
    %171 = tpu.matmul %169, %170, %cst_63 {dimension_numbers = #tpu.dot_dimension_numbers<[1], [0], [0], [1], [0, 0, 1, 1], [], []>} : vector<32x384xbf16>, vector<384x128xbf16>, vector<32x128xf32> -> vector<32x128xf32>
    %cst_64 = arith.constant dense<0.000000e+00> : vector<128xf32>
    %172 = vector.multi_reduction <add>, %171, %cst_64 [0] : vector<32x128xf32> to vector<128xf32>
    %173 = vector.shape_cast %172 : vector<128xf32> to vector<1x128xf32>
    %174 = arith.mulf %171, %171 : vector<32x128xf32>
    %cst_65 = arith.constant dense<0.000000e+00> : vector<128xf32>
    %175 = vector.multi_reduction <add>, %174, %cst_65 [0] : vector<32x128xf32> to vector<128xf32>
    %176 = vector.shape_cast %175 : vector<128xf32> to vector<1x128xf32>
    %177 = tpu.concatenate %173, %176 in 0 : vector<1x128xf32>, vector<1x128xf32> -> vector<2x128xf32>
    %c0_66 = arith.constant 0 : index
    %c0_67 = arith.constant 0 : index
    %178 = vector.load %arg4[%c0_66, %c0_67] : memref<128x128xf32, #tpu.memory_space<vmem>>, vector<128x128xf32>
    %cst_68 = arith.constant dense<0.000000e+00> : vector<2x128xf32>
    %179 = tpu.matmul %177, %178, %cst_68 {dimension_numbers = #tpu.dot_dimension_numbers<[1], [0], [0], [1], [0, 0, 1, 1], [], []>} : vector<2x128xf32>, vector<128x128xf32>, vector<2x128xf32> -> vector<2x128xf32>
    %cst_69 = arith.constant 0.001953125 : f32
    %180 = vector.broadcast %cst_69 : f32 to vector<2x128xf32>
    %181 = arith.mulf %179, %180 : vector<2x128xf32>
    %182 = vector.extract_strided_slice %181 {offsets = [0, 0], sizes = [1, 128], strides = [1, 1]} : vector<2x128xf32> to vector<1x128xf32>
    %183 = vector.extract_strided_slice %181 {offsets = [1, 0], sizes = [1, 128], strides = [1, 1]} : vector<2x128xf32> to vector<1x128xf32>
    %184 = arith.mulf %182, %182 : vector<1x128xf32>
    %185 = arith.subf %183, %184 : vector<1x128xf32>
    %186 = vector.broadcast %182 : vector<1x128xf32> to vector<32x128xf32>
    %187 = arith.subf %171, %186 : vector<32x128xf32>
    %cst_70 = arith.constant 9.99999974E-6 : f32
    %188 = vector.broadcast %cst_70 : f32 to vector<1x128xf32>
    %189 = arith.addf %185, %188 : vector<1x128xf32>
    %190 = math.rsqrt %189 : vector<1x128xf32>
    %191 = vector.broadcast %190 : vector<1x128xf32> to vector<32x128xf32>
    %192 = arith.mulf %187, %191 : vector<32x128xf32>
    %193 = vector.broadcast %114 : vector<1x128xf32> to vector<32x128xf32>
    %194 = arith.mulf %192, %193 : vector<32x128xf32>
    %195 = vector.broadcast %115 : vector<1x128xf32> to vector<32x128xf32>
    %196 = arith.addf %194, %195 : vector<32x128xf32>
    %cst_71 = arith.constant 0.000000e+00 : f32
    %197 = vector.broadcast %cst_71 : f32 to vector<32x128xf32>
    %198 = arith.maximumf %196, %197 : vector<32x128xf32>
    %199 = arith.addf %198, %111 : vector<32x128xf32>
    %c0_72 = arith.constant 0 : index
    %c0_73 = arith.constant 0 : index
    %200 = vector.load %arg7[%c0_72, %c0_73] : memref<32x128xf32, #tpu.memory_space<vmem>>, vector<32x128xf32>
    tpu.vector_store %arg7[%c0_72, %c0_73], %199 {strides = array<i32>} : memref<32x128xf32, #tpu.memory_space<vmem>>, vector<32x128xf32>,
    return
  }
}

</mosaic_0001>

<bundles_post_ra>
// kernel: tile.43
= control target key start
LH: loop header
LB: loop body
LE: loop exit
PB: predicated region body
PF: predicated region fallthrough
CT: control target
= control target key end

     0   :  { %s28_s0 = inlined_call_operand.vmem [shape: f32[8], index: 0, kind: input, shape index: {}]   ;;  %s29_s1 = inlined_call_operand.vmem [shape: f32[16,8], index: 1, kind: output, shape index: {}]  }
   0x1   :  { %v4_v0 = vld [vmem:[%s28_s0] ss:$0 sm:$0xff] }
   0x2   :  { %5 = vst [vmem:[%s29_s1] sm:$0xff] %v4_v0 }
   0x3   :  { %8 = vst [vmem:[%s29_s1 + $0x8] sm:$0xff] %v4_v0 }

// kernel: tile.56
= control target key start
LH: loop header
LB: loop body
LE: loop exit
PB: predicated region body
PF: predicated region fallthrough
CT: control target
= control target key end

     0   :  { %s131_s10 = smov 120   ;;  %s132_s11 = smov 104   ;;  %vm3_vm0 = vcmask 64512   ;;  %vm9_vm1 = vcmask 1048512   ;;  %vm15_vm2 = vcmask 982912   ;;  %vm21_vm3 = vcmask 917312   ;;  %s207_s0 = inlined_call_operand.vmem [shape: f32[16,8], index: 0, kind: input, shape index: {}]   ;;  %s208_s1 = inlined_call_operand.vmem [shape: f32[1,128], index: 1, kind: output, shape index: {}]  }
   0x1   :  { %v101_v0 = vld [vmem:[%s207_s0 + $0xf] sm:$0x1]   ;;  %v103_v1 = vld [vmem:[%s207_s0 + $0xd] sm:$0x1]   ;;  %v105_v2 = vld [vmem:[%s207_s0 + $0xb] sm:$0x1]  }
   0x2   :  { %7 = vrot.lane.b32.xlu0 %v101_v0, %s131_s10  ;;  %19 = vrot.lane.b32.xlu1 %v103_v1, %s132_s11  ;;  %s133_s14 = smov 88   ;;  %v102_v3 = vld [vmem:[%s207_s0 + $0xe] sm:$0x1]   ;;  %v104_v4 = vld [vmem:[%s207_s0 + $0xc] sm:$0x1]   ;;  %s134_s19 = smov 112  }
   0x3   :  { %31 = vrot.lane.b32.xlu2 %v105_v2, %s133_s14  ;;  %s135_s20 = smov 96   ;;  %v106_v5 = vld [vmem:[%s207_s0 + $0xa] sm:$0x1]   ;;  %s136_s23 = smov 80   ;;  %v107_v6 = vld [vmem:[%s207_s0 + $0x9] sm:$0x1]  }
   0x4   :  { %v108_v7 = vld [vmem:[%s207_s0 + $0x8] sm:$0x1]   ;;  %s137_s28 = smov 72   ;;  %s138_s29 = smov 64   ;;  %v109_v8 = vld [vmem:[%s207_s0 + $0x7] sm:$0x1]  }
   0x5   :  { %s139_s3 = smov 56   ;;  %v110_v9 = vld [vmem:[%s207_s0 + $0x6] sm:$0x1]   ;;  %v111_v10 = vld [vmem:[%s207_s0 + $0x5] sm:$0x1]   ;;  %s140_s8 = smov 48  }
   0x6   :  { %s141_s9 = smov 40   ;;  %v112_v11 = vld [vmem:[%s207_s0 + $0x4] sm:$0x1]   ;;  %s142_s12 = smov 32   ;;  %v113_v12 = vld [vmem:[%s207_s0 + $0x3] sm:$0x1]  }
   0x7   :  { %v114_v13 = vld [vmem:[%s207_s0 + $0x2] sm:$0x1]   ;;  %s143_s17 = smov 24   ;;  %s144_s18 = smov 16   ;;  %v115_v14 = vld [vmem:[%s207_s0 + $0x1] sm:$0x1]  }
   0x8   :  { %s145_s21 = smov 8   ;;  %v2_v15 = vld [vmem:[%s207_s0] sm:$0x1]   ;;  %vm27_vm4 = vcmask 851712   ;;  %vm33_vm5 = vcmask 786112   ;;  %vm39_vm6 = vcmask 720512  }
   0x9   :  { %4 = vst.msk [vmem:[#allocation0] sm:$0x1] %vm3_vm0, %v2_v15   ;;  %vm45_vm7 = vcmask 654912   ;;  %vm51_vm8 = vcmask 589312   ;;  %vm57_vm9 = vcmask 523712   ;;  %vm63_vm10 = vcmask 458112  }
   0xa   :  { %13 = vrot.lane.b32.xlu0 %v102_v3, %s134_s19  ;;  %25 = vrot.lane.b32.xlu1 %v104_v4, %s135_s20  ;;  %vm69_vm11 = vcmask 392512   ;;  %vm75_vm12 = vcmask 326912   ;;  %vm81_vm13 = vcmask 261312   ;;  %vm87_vm14 = vcmask 195712  }
   0xb   :  { %37 = vrot.lane.b32.xlu2 %v106_v5, %s136_s23  ;;  %vm93_vm15 = vcmask 130112  }
  0x12   :  { %43 = vrot.lane.b32.xlu0 %v107_v6, %s137_s28  ;;  %49 = vrot.lane.b32.xlu1 %v108_v7, %s138_s29 }
  0x13   :  { %55 = vrot.lane.b32.xlu2 %v109_v8, %s139_s3 }
  0x1a   :  { %61 = vrot.lane.b32.xlu0 %v110_v9, %s140_s8  ;;  %67 = vrot.lane.b32.xlu1 %v111_v10, %s141_s9 }
  0x1b   :  { %73 = vrot.lane.b32.xlu2 %v112_v11, %s142_s12 }
  0x22   :  { %79 = vrot.lane.b32.xlu0 %v113_v12, %s143_s17  ;;  %85 = vrot.lane.b32.xlu1 %v114_v13, %s144_s18 }
  0x23   :  { %91 = vrot.lane.b32.xlu2 %v115_v14, %s145_s21 }
  0x5d   :  { %v32_v16 = vpop.permute.xlu2 %31  }
  0x65   :  { %v38_v17 = vpop.permute.xlu2 %37  }
  0x6d   :  { %v56_v18 = vpop.permute.xlu2 %55  }
  0x74   :  { %v8_v19 = vpop.permute.xlu0 %7   ;;  %v20_v20 = vpop.permute.xlu1 %19  }
  0x75   :  { %10 = vst.msk [vmem:[#allocation0] sm:$0x1] %vm9_vm1, %v8_v19   ;;  %v74_v21 = vpop.permute.xlu2 %73  }
  0x7c   :  { %v14_v22 = vpop.permute.xlu0 %13   ;;  %v26_v23 = vpop.permute.xlu1 %25  }
  0x7d   :  { %16 = vst.msk [vmem:[#allocation0] sm:$0x1] %vm15_vm2, %v14_v22   ;;  %v92_v24 = vpop.permute.xlu2 %91  }
  0x7e   :  { %22 = vst.msk [vmem:[#allocation0] sm:$0x1] %vm21_vm3, %v20_v20  }
  0x7f   :  { %28 = vst.msk [vmem:[#allocation0] sm:$0x1] %vm27_vm4, %v26_v23  }
  0x80   :  { %34 = vst.msk [vmem:[#allocation0] sm:$0x1] %vm33_vm5, %v32_v16  }
  0x81   :  { %40 = vst.msk [vmem:[#allocation0] sm:$0x1] %vm39_vm6, %v38_v17  }
  0x84   :  { %v44_v25 = vpop.permute.xlu0 %43   ;;  %v50_v26 = vpop.permute.xlu1 %49  }
  0x85   :  { %46 = vst.msk [vmem:[#allocation0] sm:$0x1] %vm45_vm7, %v44_v25  }
  0x86   :  { %52 = vst.msk [vmem:[#allocation0] sm:$0x1] %vm51_vm8, %v50_v26  }
  0x87   :  { %58 = vst.msk [vmem:[#allocation0] sm:$0x1] %vm57_vm9, %v56_v18  }
  0x8c   :  { %v62_v27 = vpop.permute.xlu0 %61   ;;  %v68_v28 = vpop.permute.xlu1 %67  }
  0x8d   :  { %64 = vst.msk [vmem:[#allocation0] sm:$0x1] %vm63_vm10, %v62_v27  }
  0x8e   :  { %70 = vst.msk [vmem:[#allocation0] sm:$0x1] %vm69_vm11, %v68_v28  }
  0x8f   :  { %76 = vst.msk [vmem:[#allocation0] sm:$0x1] %vm75_vm12, %v74_v21  }
  0x94   :  { %v80_v29 = vpop.permute.xlu0 %79   ;;  %v86_v30 = vpop.permute.xlu1 %85  }
  0x95   :  { %82 = vst.msk [vmem:[#allocation0] sm:$0x1] %vm81_vm13, %v80_v29  }
  0x96   :  { %88 = vst.msk [vmem:[#allocation0] sm:$0x1] %vm87_vm14, %v86_v30  }
  0x97   :  { %94 = vst.msk [vmem:[#allocation0] sm:$0x1] %vm93_vm15, %v92_v24  }
  0x9e   :  { %v97_v31 = vld [vmem:[#allocation0] sm:$0x1] }
  0x9f   :  { %100 = vst [vmem:[%s208_s1] sm:$0x1] %v97_v31 }

// kernel: mg_smoothing.1
= control target key start
LH: loop header
LB: loop body
LE: loop exit
PB: predicated region body
PF: predicated region fallthrough
CT: control target
= control target key end

     0   :  { %v34_v3 = vlaneseq  ;;  %vm103_vm0 = vcmask 1040384   ;;  %vm120_vm1 = vcmask 1046528   ;;  %s2476_s2 = inlined_call_operand.vmem [shape: bf16[384,128], index: 2, kind: input, shape index: {}]   ;;  %s2477_s1 = inlined_call_operand.vmem [shape: f32[32,128], index: 1, kind: input, shape index: {}]   ;;  %s2478_s5 = inlined_call_operand.vmem [shape: f32[4,128], index: 5, kind: input, shape index: {}]   ;;  %s2479_s4 = inlined_call_operand.vmem [shape: f32[128,128], index: 4, kind: input, shape index: {}]   ;;  %s2480_s0 = inlined_call_operand.vmem [shape: f32[32,128], index: 0, kind: input, shape index: {}]   ;;  %s2481_s6 = inlined_call_operand.vmem [shape: f32[4,128], index: 6, kind: input, shape index: {}]   ;;  %s2482_s3 = inlined_call_operand.vmem [shape: bf16[384,128], index: 3, kind: input, shape index: {}]   ;;  %s2483_s7 = inlined_call_operand.vmem [shape: f32[32,128], index: 7, kind: output, shape index: {}]  }
   0x1   :  { %v1731_v0 = vld [vmem:[%s2476_s2 + $0x38] sm:$0xff]  ;;  %v1748_v4 = vld [vmem:[%s2476_s2 + $0x30] sm:$0xff]  ;;  %v1766_v8 = vld [vmem:[%s2476_s2 + $0x28] sm:$0xff] }
   0x2   :  { %v1736_v1 = vld [vmem:[%s2476_s2 + $0x78] sm:$0xff]  ;;  %377 = vmatpush.bf16.msra.mxu0 %v1731_v0  ;;  %v1753_v5 = vld [vmem:[%s2476_s2 + $0x70] sm:$0xff]  ;;  %v35_v7 = vshrl.u32 %v34_v3, 7  ;;  %v1771_v9 = vld [vmem:[%s2476_s2 + $0x68] sm:$0xff] }
   0x3   :  { %v1741_v2 = vld [vmem:[%s2476_s2 + $0xb8] sm:$0xff]  ;;  %396 = vmatpush.bf16.msra.mxu1 %v1736_v1  ;;  %v1759_v6 = vld [vmem:[%s2476_s2 + $0xb0] sm:$0xff]  ;;  %v1777_v10 = vld [vmem:[%s2476_s2 + $0xa8] sm:$0xff] }
   0x4   :  { %415 = vmatpush.bf16.msra.mxu2 %v1741_v2  ;;  %v30_v11 = vld [vmem:[%s2477_s1] sm:$0xff]  ;;  %v36_v12 = vadd.s32 8, %v35_v7  ;;  %v1785_v13 = vld [vmem:[%s2477_s1 + $0x8] sm:$0xff]  ;;  %v1790_v14 = vld [vmem:[%s2477_s1 + $0x10] sm:$0xff]  ;;  %v43_v18 = vand.u32 15, %v35_v7  ;;  %v37_v48 = vadd.s32 16, %v35_v7 }
   0x5   :  { %v1797_v15 = vld [vmem:[%s2476_s2 + $0x20] sm:$0xff]  ;;  %v104_v19 = vrot.slane %v30_v11, 7  ;;  %v122_v21 = vrot.slane %v1785_v13, 1  ;;  %v124_v22 = vrot.slane %v1790_v14, 1  ;;  %v1817_v23 = vld [vmem:[%s2476_s2 + $0x18] sm:$0xff]  ;;  %v105_v25 = vrot.slane %v1785_v13, 7 }
   0x6   :  { %378 = vmatpush.bf16.msra.mxu0 %v1748_v4  ;;  %v1802_v16 = vld [vmem:[%s2476_s2 + $0x60] sm:$0xff]  ;;  %v50_v20 = vand.u32 15, %v36_v12  ;;  %v1822_v24 = vld [vmem:[%s2476_s2 + $0x58] sm:$0xff]  ;;  %vm1831_vm2 = vcmp.eq.s32.totalorder %v43_v18, 0  ;;  %v121_v29 = vrot.slane %v30_v11, 1  ;;  %v1848_v32 = vld [vmem:[%s2476_s2 + $0x10] sm:$0xff]  ;;  %v141_v41 = vpack.c.bf16 %v30_v11, %v30_v11 }
   0x7   :  { %397 = vmatpush.bf16.msra.mxu1 %v1753_v5  ;;  %v1808_v17 = vld [vmem:[%s2476_s2 + $0xa0] sm:$0xff]  ;;  %v1829_v26 = vld [vmem:[%s2476_s2 + $0x98] sm:$0xff]  ;;  %v115_v28 = vsel %vm103_vm0, 0.0, %v104_v19  ;;  %v125_v31 = vsel %vm120_vm1, %v122_v21, %v124_v22  ;;  %v1853_v33 = vld [vmem:[%s2476_s2 + $0x50] sm:$0xff]  ;;  %v106_v34 = vsel %vm103_vm0, %v104_v19, %v105_v25  ;;  %v142_v42 = vpack.c.bf16 %v1785_v13, %v1785_v13 }
   0x8   :  { %416 = vmatpush.bf16.msra.mxu2 %v1759_v6  ;;  %vm1836_vm3 = vcmp.eq.s32.totalorder %v50_v20, 15  ;;  %v116_v35 = vsel %vm1831_vm2, 0.0, %v115_v28  ;;  %v1862_v36 = vld [vmem:[%s2476_s2 + $0x90] sm:$0xff]  ;;  %v123_v37 = vsel %vm120_vm1, %v121_v29, %v122_v21  ;;  %v138_v40 = vpack.c.bf16 %v106_v34, %v106_v34  ;;  %v1874_v43 = vld [vmem:[%s2476_s2 + $0x8] sm:$0xff]  ;;  %v1890_v54 = vld [vmem:[%s2477_s1 + $0x18] sm:$0xff] }
   0x9   :  { %v134_v38 = vsel %vm1836_vm3, 0.0, %v125_v31  ;;  %v137_v39 = vpack.c.bf16 %v116_v35, %v116_v35  ;;  %v1879_v44 = vld [vmem:[%s2476_s2 + $0x48] sm:$0xff]  ;;  %v145_v45 = vpack.c.bf16 %v123_v37, %v123_v37  ;;  %v38_v49 = vadd.s32 24, %v35_v7  ;;  %2508 = vst [vmem:[#allocation2_spill] sm:$0xff] %v1890_v54  ;;  %v1897_v55 = vld [vmem:[%s2476_s2] sm:$0xff] }
   0xa   :  { %379 = vmatpush.bf16.msra.mxu0 %v1766_v8  ;;  %v146_v46 = vpack.c.bf16 %v134_v38, %v134_v38  ;;  %v1885_v47 = vld [vmem:[%s2476_s2 + $0x88] sm:$0xff]  ;;  %v154_v51 = vunpack.c.l.b16 %v138_v40  ;;  %v165_v52 = vunpack.c.l.b16 %v141_v41  ;;  %v166_v53 = vunpack.c.l.b16 %v142_v42  ;;  %v1902_v56 = vld [vmem:[%s2476_s2 + $0x40] sm:$0xff] }
   0xb   :  { %398 = vmatpush.bf16.msra.mxu1 %v1771_v9  ;;  %v153_v50 = vunpack.c.l.b16 %v137_v39  ;;  %v177_v57 = vunpack.c.l.b16 %v145_v45  ;;  %v1908_v59 = vld [vmem:[%s2476_s2 + $0x80] sm:$0xff]  ;;  %v57_v60 = vand.u32 15, %v37_v48  ;;  %v107_v61 = vrot.slane %v1790_v14, 7 }
   0xc   :  { %417 = vmatpush.bf16.msra.mxu2 %v1777_v10  ;;  %v178_v58 = vunpack.c.l.b16 %v146_v46  ;;  %v64_v62 = vand.u32 15, %v38_v49  ;;  %v126_v63 = vrot.slane %v1890_v54, 1  ;;  %v169_v7 = vpack.c.b16 %v166_v53, %v165_v52  ;;  %v1953_v52 = vld [vmem:[%s2479_s4 + $0x68] sm:$0xff]  ;;  %v1959_v53 = vld [vmem:[%s2479_s4 + $0x60] sm:$0xff] }
   0xd   :  { %v157_v3 = vpack.c.b16 %v154_v51, %v153_v50  ;;  %v109_v12 = vrot.slane %v1890_v54, 7  ;;  %vm1916_vm4 = vcmp.eq.s32.totalorder %v57_v60, 0  ;;  %v108_v18 = vsel %vm103_vm0, %v105_v25, %v107_v61  ;;  %v1947_v51 = vld [vmem:[%s2479_s4 + $0x70] sm:$0xff]  ;;  %2514 = vst [vmem:[#allocation4_spill] sm:$0xff] %v1953_v52 }
   0xe   :  { %380 = vmatpush.bf16.msra.mxu0 %v1797_v15  ;;  %v181_v11 = vpack.c.b16 %v178_v58, %v177_v57  ;;  %vm1921_vm5 = vcmp.eq.s32.totalorder %v64_v62, 15  ;;  %v132_v20 = vsel %vm120_vm1, %v126_v63, 0.0  ;;  %v118_v28 = vsel %vm1916_vm4, 0.0, %v108_v18  ;;  %2513 = vst [vmem:[#allocation3_spill] sm:$0xff] %v1947_v51  ;;  %v1965_v57 = vld [vmem:[%s2479_s4 + $0x58] sm:$0xff]  ;;  %v1971_v58 = vld [vmem:[%s2479_s4 + $0x50] sm:$0xff] }
   0xf   :  { %399 = vmatpush.bf16.msra.mxu1 %v1802_v16  ;;  %v110_v21 = vsel %vm103_vm0, %v107_v61, %v109_v12  ;;  %v127_v29 = vsel %vm120_vm1, %v124_v22, %v126_v63  ;;  %v136_v25 = vsel %vm1921_vm5, 0.0, %v132_v20  ;;  %v139_v31 = vpack.c.bf16 %v118_v28, %v118_v28  ;;  %2515 = vst [vmem:[#allocation5_spill] sm:$0xff] %v1959_v53  ;;  %v1977_v62 = vld [vmem:[%s2479_s4 + $0x48] sm:$0xff]  ;;  %v1983_v63 = vld [vmem:[%s2479_s4 + $0x40] sm:$0xff]  ;;  %v2012_v28 = vld [vmem:[%s2479_s4 + $0x18] sm:$0xff] }
  0x10   :  { %418 = vmatpush.bf16.msra.mxu2 %v1808_v17  ;;  %v140_v34 = vpack.c.bf16 %v110_v21, %v110_v21  ;;  %v143_v35 = vpack.c.bf16 %v1790_v14, %v1790_v14  ;;  %v144_v37 = vpack.c.bf16 %v1890_v54, %v1890_v54  ;;  %v147_v38 = vpack.c.bf16 %v127_v29, %v127_v29  ;;  %v1941_v14 = vld [vmem:[%s2479_s4 + $0x78] sm:$0xff]  ;;  %v2000_v12 = vld [vmem:[%s2479_s4 + $0x28] sm:$0xff]  ;;  %v2006_v21 = vld [vmem:[%s2479_s4 + $0x20] sm:$0xff] }
  0x11   :  { %v148_v39 = vpack.c.bf16 %v136_v25, %v136_v25  ;;  %v155_v40 = vunpack.c.l.b16 %v139_v31  ;;  %477 = vmatpush.msra.mxu3 %v1941_v14  ;;  %2516 = vst [vmem:[#allocation6_spill] sm:$0xff] %v1965_v57  ;;  %v2018_v29 = vld [vmem:[%s2479_s4 + $0x10] sm:$0xff]  ;;  %v2024_v31 = vld [vmem:[%s2479_s4 + $0x8] sm:$0xff]  ;;  %v2192_v54 = vld [vmem:[%s2482_s3 + $0x98] sm:$0xff] }
  0x12   :  { %381 = vmatpush.bf16.msra.mxu0 %v1817_v23  ;;  %v156_v41 = vunpack.c.l.b16 %v140_v34  ;;  %v167_v42 = vunpack.c.l.b16 %v143_v35  ;;  %v168_v45 = vunpack.c.l.b16 %v144_v37  ;;  %v179_v46 = vunpack.c.l.b16 %v147_v38  ;;  %2517 = vst [vmem:[#allocation7_spill] sm:$0xff] %v1971_v58  ;;  %v2030_v37 = vld [vmem:[%s2479_s4] sm:$0xff] }
  0x13   :  { %400 = vmatpush.bf16.msra.mxu1 %v1822_v24  ;;  %v180_v48 = vunpack.c.l.b16 %v148_v39  ;;  %478 = vmatpush.msra.mxu3 %v1947_v51  ;;  %2518 = vst [vmem:[#allocation8_spill] sm:$0xff] %v1977_v62 }
  0x14   :  { %419 = vmatpush.bf16.msra.mxu2 %v1829_v26  ;;  %v158_v22 = vpack.c.b16 %v156_v41, %v155_v40  ;;  %v170_v49 = vpack.c.b16 %v168_v45, %v167_v42  ;;  %2519 = vst [vmem:[#allocation9_spill] sm:$0xff] %v1983_v63  ;;  %v2038_v42 = vld [vmem:[%s2480_s0 + $0x8] sm:$0xff] }
  0x15   :  { %v182_v50 = vpack.c.b16 %v180_v48, %v179_v46  ;;  %479 = vmatpush.msra.mxu3 %v1953_v52  ;;  %2522 = vst [vmem:[#allocation12_spill] sm:$0xff] %v2000_v12 }
  0x16   :  { %382 = vmatpush.bf16.msra.mxu0 %v1848_v32  ;;  %2523 = vst [vmem:[#allocation13_spill] sm:$0xff] %v2006_v21 }
  0x17   :  { %401 = vmatpush.bf16.msra.mxu1 %v1853_v33  ;;  %480 = vmatpush.msra.mxu3 %v1959_v53  ;;  %2524 = vst [vmem:[#allocation14_spill] sm:$0xff] %v2012_v28 }
  0x18   :  { %420 = vmatpush.bf16.msra.mxu2 %v1862_v36  ;;  %2525 = vst [vmem:[#allocation15_spill] sm:$0xff] %v2018_v29 }
  0x19   :  { %481 = vmatpush.msra.mxu3 %v1965_v57  ;;  %2526 = vst [vmem:[#allocation16_spill] sm:$0xff] %v2024_v31 }
  0x1a   :  { %383 = vmatpush.bf16.msra.mxu0 %v1874_v43  ;;  %2527 = vst [vmem:[#allocation17_spill] sm:$0xff] %v2030_v37 }
  0x1b   :  { %402 = vmatpush.bf16.msra.mxu1 %v1879_v44  ;;  %482 = vmatpush.msra.mxu3 %v1971_v58  ;;  %2528 = vst [vmem:[#allocation18_spill] sm:$0xff] %v2038_v42 }
  0x1c   :  { %421 = vmatpush.bf16.msra.mxu2 %v1885_v47 }
  0x1d   :  { %483 = vmatpush.msra.mxu3 %v1977_v62 }
  0x1e   :  { %384 = vmatpush.bf16.msra.mxu0 %v1897_v55 }
  0x1f   :  { %403 = vmatpush.bf16.msra.mxu1 %v1902_v56  ;;  %484 = vmatpush.msra.mxu3 %v1983_v63 }
  0x20   :  { %422 = vmatpush.bf16.msra.mxu2 %v1908_v59 }
  0x21   :  { %385 = vmatmul.bf16.vlgmr.msra.gmra.mxu0 %v157_v3  ;;  %v1989_v3 = vld [vmem:[%s2479_s4 + $0x38] sm:$0xff] }
  0x22   :  { %404 = vmatmul.bf16.vlgmr.msra.gmra.mxu1 %v169_v7  ;;  %2520 = vst [vmem:[#allocation10_spill] sm:$0xff] %v1989_v3  ;;  %485 = vmatpush.msra.mxu3 %v1989_v3  ;;  %v1995_v7 = vld [vmem:[%s2479_s4 + $0x30] sm:$0xff] }
  0x23   :  { %423 = vmatmul.bf16.vlgmr.msra.gmra.mxu2 %v181_v11  ;;  %2521 = vst [vmem:[#allocation11_spill] sm:$0xff] %v1995_v7 }
  0x24   :  { %486 = vmatpush.msra.mxu3 %v1995_v7 }
  0x26   :  { %487 = vmatpush.msra.mxu3 %v2000_v12 }
  0x28   :  { %488 = vmatpush.msra.mxu3 %v2006_v21 }
  0x2a   :  { %489 = vmatpush.msra.mxu3 %v2012_v28 }
  0x2c   :  { %490 = vmatpush.msra.mxu3 %v2018_v29 }
  0x2e   :  { %491 = vmatpush.msra.mxu3 %v2024_v31 }
  0x30   :  { %492 = vmatpush.msra.mxu3 %v2030_v37 }
  0x31   :  { %390 = vmatmul.bf16.gmra.mxu0 %v158_v22  ;;  %v2044_v22 = vld [vmem:[%s2480_s0] sm:$0xff] }
  0x32   :  { %409 = vmatmul.bf16.gmra.mxu1 %v170_v49  ;;  %894 = vmatpush.msrb.mxu3 %v1941_v14  ;;  %2529 = vst [vmem:[#allocation19_spill] sm:$0xff] %v2044_v22  ;;  %v2049_v49 = vld [vmem:[%s2480_s0 + $0x10] sm:$0xff] }
  0x33   :  { %428 = vmatmul.bf16.gmra.mxu2 %v182_v50  ;;  %2530 = vst [vmem:[#allocation20_spill] sm:$0xff] %v2049_v49 }
  0x34   :  { %895 = vmatpush.msrb.mxu3 %v1947_v51 }
  0x36   :  { %896 = vmatpush.msrb.mxu3 %v1953_v52 }
  0x38   :  { %897 = vmatpush.msrb.mxu3 %v1959_v53 }
  0x3a   :  { %898 = vmatpush.msrb.mxu3 %v1965_v57 }
  0x3c   :  { %899 = vmatpush.msrb.mxu3 %v1971_v58 }
  0x3e   :  { %900 = vmatpush.msrb.mxu3 %v1977_v62 }
  0x40   :  { %901 = vmatpush.msrb.mxu3 %v1983_v63 }
  0x42   :  { %902 = vmatpush.msrb.mxu3 %v1989_v3 }
  0x44   :  { %903 = vmatpush.msrb.mxu3 %v1995_v7 }
  0x46   :  { %904 = vmatpush.msrb.mxu3 %v2000_v12 }
  0x48   :  { %905 = vmatpush.msrb.mxu3 %v2006_v21 }
  0x4a   :  { %906 = vmatpush.msrb.mxu3 %v2012_v28 }
  0x4c   :  { %907 = vmatpush.msrb.mxu3 %v2018_v29 }
  0x4e   :  { %908 = vmatpush.msrb.mxu3 %v2024_v31 }
  0x50   :  { %909 = vmatpush.msrb.mxu3 %v2030_v37 }
  0x9e   :  { %v386_v60 = vpop.f32.mrf.mxu0 }
  0x9f   :  { %v405_v61 = vpop.f32.mrf.mxu1 }
  0xa0   :  { %v406_v38 = vadd.f32 %v405_v61, %v386_v60 }
  0xa6   :  { %v424_v11 = vpop.f32.mrf.mxu2  ;;  %v388_v18 = vpop.f32.mrf.mxu0 }
  0xa7   :  { %v407_v20 = vpop.f32.mrf.mxu1  ;;  %v425_v46 = vadd.f32 %v424_v11, %v406_v38 }
  0xa8   :  { %v408_v39 = vadd.f32 %v407_v20, %v388_v18 }
  0xa9   :  { %v2057_v11 = vsub.f32 %v2044_v22, %v425_v46 }
  0xab   :  { %v447_v38 = vmul.f32 %v2057_v11, %v2057_v11 }
  0xae   :  { %v426_v25 = vpop.f32.mrf.mxu2  ;;  %v391_v34 = vpop.f32.mrf.mxu0 }
  0xaf   :  { %v410_v35 = vpop.f32.mrf.mxu1  ;;  %v427_v41 = vadd.f32 %v426_v25, %v408_v39 }
  0xb0   :  { %v411_v40 = vadd.f32 %v410_v35, %v391_v34  ;;  %v2068_v34 = vld [vmem:[%s2480_s0 + $0x18] sm:$0xff] }
  0xb1   :  { %v2053_v50 = vsub.f32 %v2038_v42, %v427_v41  ;;  %2531 = vst [vmem:[#allocation21_spill] sm:$0xff] %v2068_v34 }
  0xb3   :  { %v448_v20 = vmul.f32 %v2053_v50, %v2053_v50  ;;  %v438_v39 = vadd.f32 %v2053_v50, %v2057_v11 }
  0xb6   :  { %v429_v45 = vpop.f32.mrf.mxu2  ;;  %v393_v60 = vpop.f32.mrf.mxu0 }
  0xb7   :  { %v430_v48 = vadd.f32 %v429_v45, %v411_v40  ;;  %v412_v61 = vpop.f32.mrf.mxu1  ;;  %v451_v45 = vadd.f32 %v448_v20, %v447_v38 }
  0xb8   :  { %v413_v25 = vadd.f32 %v412_v61, %v393_v60 }
  0xb9   :  { %v2060_v18 = vsub.f32 %v2049_v49, %v430_v48 }
  0xbb   :  { %v449_v40 = vmul.f32 %v2060_v18, %v2060_v18  ;;  %v439_v46 = vadd.f32 %v438_v39, %v2060_v18 }
  0xbd   :  { %v452_v60 = vadd.f32 %v451_v45, %v449_v40 }
  0xbe   :  { %v431_v35 = vpop.f32.mrf.mxu2 }
  0xbf   :  { %v432_v41 = vadd.f32 %v431_v35, %v413_v25 }
  0xc1   :  { %v2080_v48 = vsub.f32 %v2068_v34, %v432_v41 }
  0xc3   :  { %v440_v61 = vadd.f32 %v439_v46, %v2080_v48  ;;  %v450_v49 = vmul.f32 %v2080_v48, %v2080_v48 }
  0xc5   :  { %v441_v22 = vrot.slane %v440_v61, 4  ;;  %v453_v25 = vadd.f32 %v452_v60, %v450_v49 }
  0xc7   :  { %v442_v20 = vadd.f32 %v441_v22, %v440_v61  ;;  %v454_v35 = vrot.slane %v453_v25, 4  ;;  %v2120_v61 = vld [vmem:[%s2482_s3 + $0xb8] sm:$0xff] }
  0xc8   :  { %852 = vmatpush.bf16.msrb.mxu2 %v2120_v61 }
  0xc9   :  { %v443_v38 = vrot.slane %v442_v20, 2  ;;  %v455_v39 = vadd.f32 %v454_v35, %v453_v25  ;;  %v2125_v25 = vld [vmem:[%s2482_s3 + $0x38] sm:$0xff]  ;;  %v2138_v35 = vld [vmem:[%s2482_s3 + $0xb0] sm:$0xff] }
  0xca   :  { %814 = vmatpush.bf16.msrb.mxu0 %v2125_v25 }
  0xcb   :  { %v444_v40 = vadd.f32 %v443_v38, %v442_v20  ;;  %v456_v41 = vrot.slane %v455_v39, 2  ;;  %v2130_v20 = vld [vmem:[%s2482_s3 + $0x70] sm:$0xff] }
  0xcc   :  { %v2143_v38 = vld [vmem:[%s2482_s3 + $0x30] sm:$0xff]  ;;  %853 = vmatpush.bf16.msrb.mxu2 %v2138_v35 }
  0xcd   :  { %v445_v45 = vrot.slane %v444_v40, 1  ;;  %v457_v46 = vadd.f32 %v456_v41, %v455_v39  ;;  %v2148_v39 = vld [vmem:[%s2482_s3 + $0x68] sm:$0xff] }
  0xce   :  { %815 = vmatpush.bf16.msrb.mxu0 %v2143_v38  ;;  %v2161_v41 = vld [vmem:[%s2482_s3 + $0x28] sm:$0xff] }
  0xcf   :  { %v458_v34 = vrot.slane %v457_v46, 1  ;;  %v446_v49 = vadd.f32 %v445_v45, %v444_v40  ;;  %v2156_v40 = vld [vmem:[%s2482_s3 + $0xa8] sm:$0xff]  ;;  %v2166_v45 = vld [vmem:[%s2482_s3 + $0x60] sm:$0xff] }
  0xd0   :  { %854 = vmatpush.bf16.msrb.mxu2 %v2156_v40 }
  0xd1   :  { %v459_v22 = vadd.f32 %v458_v34, %v457_v46  ;;  %v2114_v34 = vld [vmem:[%s2482_s3 + $0x78] sm:$0xff]  ;;  %v2174_v46 = vld [vmem:[%s2482_s3 + $0xa0] sm:$0xff] }
  0xd2   :  { %833 = vmatpush.bf16.msrb.mxu1 %v2114_v34  ;;  %816 = vmatpush.bf16.msrb.mxu0 %v2161_v41 }
  0xd3   :  { %v460_v60 = vsel %vm103_vm0, %v446_v49, %v459_v22  ;;  %v2179_v49 = vld [vmem:[%s2482_s3 + $0x20] sm:$0xff]  ;;  %v2184_v22 = vld [vmem:[%s2482_s3 + $0x58] sm:$0xff] }
  0xd4   :  { %493 = vmatmul.f32.vlgmr.msra.gmra.mxu3 %v460_v60  ;;  %855 = vmatpush.bf16.msrb.mxu2 %v2174_v46 }
  0xd5   :  { %1131 = vmatpush.msra.mxu3 %v1941_v14 }
  0xd6   :  { %834 = vmatpush.bf16.msrb.mxu1 %v2130_v20  ;;  %817 = vmatpush.bf16.msrb.mxu0 %v2179_v49 }
  0xd7   :  { %1132 = vmatpush.msra.mxu3 %v1947_v51 }
  0xd8   :  { %856 = vmatpush.bf16.msrb.mxu2 %v2192_v54 }
  0xd9   :  { %1133 = vmatpush.msra.mxu3 %v1953_v52 }
  0xda   :  { %835 = vmatpush.bf16.msrb.mxu1 %v2148_v39 }
  0xdb   :  { %1134 = vmatpush.msra.mxu3 %v1959_v53 }
  0xdd   :  { %1135 = vmatpush.msra.mxu3 %v1965_v57 }
  0xde   :  { %836 = vmatpush.bf16.msrb.mxu1 %v2166_v45 }
  0xdf   :  { %1136 = vmatpush.msra.mxu3 %v1971_v58  ;;  %v2251_v58 = vld [vmem:[%s2482_s3] sm:$0xff] }
  0xe1   :  { %1137 = vmatpush.msra.mxu3 %v1977_v62  ;;  %v2246_v62 = vld [vmem:[%s2482_s3 + $0x80] sm:$0xff] }
  0xe2   :  { %837 = vmatpush.bf16.msrb.mxu1 %v2184_v22 }
  0xe3   :  { %1138 = vmatpush.msra.mxu3 %v1983_v63  ;;  %v2232_v63 = vld [vmem:[%s2482_s3 + $0x8] sm:$0xff] }
  0xe5   :  { %1139 = vmatpush.msra.mxu3 %v1989_v3  ;;  %v2227_v3 = vld [vmem:[%s2482_s3 + $0x88] sm:$0xff] }
  0xe7   :  { %1140 = vmatpush.msra.mxu3 %v1995_v7 }
  0xe9   :  { %1141 = vmatpush.msra.mxu3 %v2000_v12 }
  0xeb   :  { %1142 = vmatpush.msra.mxu3 %v2006_v21  ;;  %v2220_v21 = vld [vmem:[%s2482_s3 + $0x48] sm:$0xff] }
  0xed   :  { %1143 = vmatpush.msra.mxu3 %v2012_v28  ;;  %v2214_v28 = vld [vmem:[%s2482_s3 + $0x10] sm:$0xff] }
  0xef   :  { %1144 = vmatpush.msra.mxu3 %v2018_v29 }
  0xf1   :  { %1145 = vmatpush.msra.mxu3 %v2024_v31  ;;  %v2202_v31 = vld [vmem:[%s2482_s3 + $0x50] sm:$0xff] }
  0xf2   :  { %838 = vmatpush.bf16.msrb.mxu1 %v2202_v31 }
  0xf3   :  { %1146 = vmatpush.msra.mxu3 %v2030_v37  ;;  %v2197_v37 = vld [vmem:[%s2482_s3 + $0x18] sm:$0xff] }
  0xf4   :  { %818 = vmatpush.bf16.msrb.mxu0 %v2197_v37 }
  0xf6   :  { %839 = vmatpush.bf16.msrb.mxu1 %v2220_v21 }
  0xf8   :  { %819 = vmatpush.bf16.msrb.mxu0 %v2214_v28 }
  0xfc   :  { %820 = vmatpush.bf16.msrb.mxu0 %v2232_v63 }
 0x100   :  { %821 = vmatpush.bf16.msrb.mxu0 %v2251_v58 }
 0x104   :  { %1047 = vmatpush.bf16.msra.mxu0 %v1731_v0 }
 0x108   :  { %1048 = vmatpush.bf16.msra.mxu0 %v1748_v4 }
 0x10c   :  { %1049 = vmatpush.bf16.msra.mxu0 %v1766_v8  ;;  %v1669_v8 = vld [vmem:[%s2478_s5] ss:$0 sm:$0xff] }
 0x110   :  { %1050 = vmatpush.bf16.msra.mxu0 %v1797_v15  ;;  %v1670_v15 = vld [vmem:[%s2481_s6] ss:$0 sm:$0xff] }
 0x114   :  { %1051 = vmatpush.bf16.msra.mxu0 %v1817_v23 }
 0x118   :  { %1052 = vmatpush.bf16.msra.mxu0 %v1848_v32 }
 0x11c   :  { %1053 = vmatpush.bf16.msra.mxu0 %v1874_v43 }
 0x120   :  { %1054 = vmatpush.bf16.msra.mxu0 %v1897_v55 }
 0x157   :  { %v494_v60 = vpop.f32.mrf.mxu3 }
 0x158   :  { %v497_v42 = vmul.f32 0.001953125, %v494_v60  ;;  %v2209_v60 = vld [vmem:[%s2482_s3 + $0x90] sm:$0xff] }
 0x159   :  { %857 = vmatpush.bf16.msrb.mxu2 %v2209_v60 }
 0x15a   :  { %v498_v29 = vmul.f32 %v497_v42, %v497_v42  ;;  %v503_v52 = vperm.slane %v497_v42, 0 }
 0x15c   :  { %v500_v12 = vrot.slane %v498_v29, 7  ;;  %v505_v4 = vsub.f32 %v2053_v50, %v503_v52 }
 0x15d   :  { %858 = vmatpush.bf16.msrb.mxu2 %v2227_v3 }
 0x15e   :  { %v502_v7 = vsub.f32 %v497_v42, %v500_v12  ;;  %v2238_v12 = vld [vmem:[%s2482_s3 + $0x40] sm:$0xff] }
 0x15f   :  { %840 = vmatpush.bf16.msrb.mxu1 %v2238_v12 }
 0x160   :  { %v508_v29 = vadd.f32 1e-05, %v502_v7 }
 0x161   :  { %859 = vmatpush.bf16.msrb.mxu2 %v2246_v62 }
 0x162   :  { %1677 = vrsqrt.f32 %v508_v29  ;;  %vm515_vm7 = vweird.f32 %v508_v29 }
 0x163   :  { %1066 = vmatpush.bf16.msra.mxu1 %v1736_v1 }
 0x165   :  { %1085 = vmatpush.bf16.msra.mxu2 %v1741_v2  ;;  %v504_v2 = vsub.f32 %v2057_v11, %v503_v52 }
 0x167   :  { %1067 = vmatpush.bf16.msra.mxu1 %v1753_v5 }
 0x168   :  { %v1678_v7 = vpop.eup %1677 }
 0x169   :  { %v510_v57 = vmul.f32 %v1678_v7, %v508_v29  ;;  %1086 = vmatpush.bf16.msra.mxu2 %v1759_v6  ;;  %vm516_vm6 = vweird.f32 %v1678_v7  ;;  %v506_v6 = vsub.f32 %v2060_v18, %v503_v52 }
 0x16a   :  { %vm517_vm8 = vmor %vm515_vm7, %vm516_vm6 }
 0x16b   :  { %v511_v53 = vmul.f32 %v1678_v7, %v510_v57  ;;  %1068 = vmatpush.bf16.msra.mxu1 %v1771_v9  ;;  %v507_v9 = vsub.f32 %v2080_v48, %v503_v52 }
 0x16d   :  { %v512_v1 = vmul.f32 0.5, %v511_v53  ;;  %1087 = vmatpush.bf16.msra.mxu2 %v1777_v10 }
 0x16f   :  { %v513_v51 = vsub.f32 1.5, %v512_v1  ;;  %1069 = vmatpush.bf16.msra.mxu1 %v1802_v16 }
 0x171   :  { %v514_v0 = vmul.f32 %v1678_v7, %v513_v51  ;;  %1088 = vmatpush.bf16.msra.mxu2 %v1808_v17 }
 0x173   :  { %v518_v5 = vsel %vm517_vm8, %v1678_v7, %v514_v0  ;;  %1070 = vmatpush.bf16.msra.mxu1 %v1822_v24 }
 0x174   :  { %v519_v10 = vperm.slane %v518_v5, 1 }
 0x175   :  { %1089 = vmatpush.bf16.msra.mxu2 %v1829_v26 }
 0x176   :  { %v520_v16 = vmul.f32 %v519_v10, %v504_v2  ;;  %v521_v51 = vmul.f32 %v519_v10, %v505_v4  ;;  %v522_v53 = vmul.f32 %v519_v10, %v506_v6  ;;  %v523_v17 = vmul.f32 %v519_v10, %v507_v9 }
 0x177   :  { %1071 = vmatpush.bf16.msra.mxu1 %v1853_v33 }
 0x178   :  { %v527_v52 = vmul.f32 %v1669_v8, %v522_v53  ;;  %v525_v57 = vmul.f32 %v1669_v8, %v520_v16  ;;  %v526_v42 = vmul.f32 %v1669_v8, %v521_v51  ;;  %v528_v50 = vmul.f32 %v1669_v8, %v523_v17 }
 0x179   :  { %1090 = vmatpush.bf16.msra.mxu2 %v1862_v36 }
 0x17a   :  { %v530_v11 = vadd.f32 %v1670_v15, %v525_v57  ;;  %v531_v24 = vadd.f32 %v1670_v15, %v526_v42  ;;  %v532_v18 = vadd.f32 %v1670_v15, %v527_v52  ;;  %v533_v48 = vadd.f32 %v1670_v15, %v528_v50 }
 0x17b   :  { %1072 = vmatpush.bf16.msra.mxu1 %v1879_v44 }
 0x17c   :  { %v534_v29 = vmax.f32 %v530_v11, 0.0  ;;  %v535_v7 = vmax.f32 %v531_v24, 0.0  ;;  %v536_v1 = vmax.f32 %v532_v18, 0.0  ;;  %v537_v6 = vmax.f32 %v533_v48, 0.0 }
 0x17d   :  { %1091 = vmatpush.bf16.msra.mxu2 %v1885_v47 }
 0x17e   :  { %v578_v23 = vpack.c.bf16 %v534_v29, %v534_v29  ;;  %v579_v26 = vpack.c.bf16 %v535_v7, %v535_v7  ;;  %v542_v0 = vrot.slane %v534_v29, 7  ;;  %v543_v2 = vrot.slane %v535_v7, 7 }
 0x17f   :  { %v558_v5 = vrot.slane %v534_v29, 1  ;;  %v559_v4 = vrot.slane %v535_v7, 1  ;;  %v561_v33 = vrot.slane %v536_v1, 1  ;;  %1073 = vmatpush.bf16.msra.mxu1 %v1902_v56  ;;  %v545_v42 = vrot.slane %v536_v1, 7 }
 0x180   :  { %v602_v36 = vunpack.c.l.b16 %v578_v23  ;;  %v603_v9 = vunpack.c.l.b16 %v579_v26  ;;  %v544_v32 = vsel %vm103_vm0, %v542_v0, %v543_v2  ;;  %v553_v10 = vsel %vm103_vm0, 0.0, %v542_v0 }
 0x181   :  { %v554_v44 = vsel %vm1831_vm2, 0.0, %v553_v10  ;;  %v575_v8 = vpack.c.bf16 %v544_v32, %v544_v32  ;;  %v560_v16 = vsel %vm120_vm1, %v558_v5, %v559_v4  ;;  %v562_v51 = vsel %vm120_vm1, %v559_v4, %v561_v33  ;;  %1092 = vmatpush.bf16.msra.mxu2 %v1908_v59 }
 0x182   :  { %v606_v53 = vpack.c.b16 %v603_v9, %v602_v36  ;;  %v574_v47 = vpack.c.bf16 %v554_v44, %v554_v44  ;;  %v571_v43 = vsel %vm1836_vm3, 0.0, %v562_v51  ;;  %v582_v15 = vpack.c.bf16 %v560_v16, %v560_v16 }
 0x183   :  { %v591_v17 = vunpack.c.l.b16 %v575_v8  ;;  %v583_v52 = vpack.c.bf16 %v571_v43, %v571_v43  ;;  %v563_v11 = vrot.slane %v537_v6, 1  ;;  %v547_v48 = vrot.slane %v537_v6, 7 }
 0x184   :  { %841 = vmatmul.bf16.vlgmr.msrb.gmra.mxu1 %v606_v53  ;;  %v590_v56 = vunpack.c.l.b16 %v574_v47  ;;  %v614_v57 = vunpack.c.l.b16 %v582_v15  ;;  %v546_v29 = vsel %vm103_vm0, %v543_v2, %v545_v42  ;;  %v580_v55 = vpack.c.bf16 %v536_v1, %v536_v1 }
 0x185   :  { %v615_v50 = vunpack.c.l.b16 %v583_v52  ;;  %1295 = vmatpush.bf16.msrb.mxu1 %v2114_v34  ;;  %v569_v7 = vsel %vm120_vm1, %v563_v11, 0.0  ;;  %v581_v59 = vpack.c.bf16 %v537_v6, %v537_v6  ;;  %v548_v23 = vsel %vm103_vm0, %v545_v42, %v547_v48 }
 0x186   :  { %v594_v24 = vpack.c.b16 %v591_v17, %v590_v56  ;;  %v556_v34 = vsel %vm1916_vm4, 0.0, %v546_v29  ;;  %v564_v26 = vsel %vm120_vm1, %v561_v33, %v563_v11  ;;  %v573_v0 = vsel %vm1921_vm5, 0.0, %v569_v7 }
 0x187   :  { %v618_v18 = vpack.c.b16 %v615_v50, %v614_v57  ;;  %v604_v2 = vunpack.c.l.b16 %v580_v55  ;;  %v576_v1 = vpack.c.bf16 %v556_v34, %v556_v34  ;;  %v577_v5 = vpack.c.bf16 %v548_v23, %v548_v23  ;;  %v2532_v34 = vld [vmem:[#allocation3_spill] sm:$0xff] }
 0x188   :  { %822 = vmatmul.bf16.vlgmr.msrb.gmra.mxu0 %v594_v24 }
 0x189   :  { %860 = vmatmul.bf16.vlgmr.msrb.gmra.mxu2 %v618_v18  ;;  %1276 = vmatpush.bf16.msrb.mxu0 %v2125_v25  ;;  %v605_v25 = vunpack.c.l.b16 %v581_v59  ;;  %v592_v6 = vunpack.c.l.b16 %v576_v1  ;;  %v593_v33 = vunpack.c.l.b16 %v577_v5  ;;  %v2537_v1 = vld [vmem:[#allocation8_spill] sm:$0xff]  ;;  %v2538_v5 = vld [vmem:[#allocation9_spill] sm:$0xff] }
 0x18a   :  { %1314 = vmatpush.bf16.msrb.mxu2 %v2120_v61  ;;  %1296 = vmatpush.bf16.msrb.mxu1 %v2130_v20  ;;  %v584_v61 = vpack.c.bf16 %v564_v26, %v564_v26  ;;  %v585_v20 = vpack.c.bf16 %v573_v0, %v573_v0  ;;  %v2533_v26 = vld [vmem:[#allocation4_spill] sm:$0xff]  ;;  %v2534_v0 = vld [vmem:[#allocation5_spill] sm:$0xff] }
 0x18b   :  { %v607_v4 = vpack.c.b16 %v605_v25, %v604_v2  ;;  %v595_v9 = vpack.c.b16 %v593_v33, %v592_v6  ;;  %v2535_v2 = vld [vmem:[#allocation6_spill] sm:$0xff]  ;;  %v2536_v25 = vld [vmem:[#allocation7_spill] sm:$0xff] }
 0x18c   :  { %v617_v36 = vunpack.c.l.b16 %v585_v20  ;;  %v2540_v20 = vld [vmem:[#allocation11_spill] sm:$0xff]  ;;  %v2543_v6 = vld [vmem:[#allocation14_spill] sm:$0xff] }
 0x18d   :  { %1277 = vmatpush.bf16.msrb.mxu0 %v2143_v38  ;;  %v616_v38 = vunpack.c.l.b16 %v584_v61  ;;  %v2539_v61 = vld [vmem:[#allocation10_spill] sm:$0xff]  ;;  %v2544_v33 = vld [vmem:[#allocation15_spill] sm:$0xff] }
 0x18e   :  { %1315 = vmatpush.bf16.msrb.mxu2 %v2138_v35  ;;  %1297 = vmatpush.bf16.msrb.mxu1 %v2148_v39 }
 0x18f   :  { %v619_v35 = vpack.c.b16 %v617_v36, %v616_v38  ;;  %v2545_v38 = vld [vmem:[#allocation16_spill] sm:$0xff]  ;;  %v2546_v36 = vld [vmem:[#allocation17_spill] sm:$0xff] }
 0x191   :  { %1278 = vmatpush.bf16.msrb.mxu0 %v2161_v41 }
 0x192   :  { %1316 = vmatpush.bf16.msrb.mxu2 %v2156_v40  ;;  %1298 = vmatpush.bf16.msrb.mxu1 %v2166_v45 }
 0x194   :  { %846 = vmatmul.bf16.gmra.mxu1 %v607_v4  ;;  %v2541_v4 = vld [vmem:[#allocation12_spill] sm:$0xff] }
 0x195   :  { %1279 = vmatpush.bf16.msrb.mxu0 %v2179_v49 }
 0x196   :  { %1317 = vmatpush.bf16.msrb.mxu2 %v2174_v46  ;;  %1299 = vmatpush.bf16.msrb.mxu1 %v2184_v22 }
 0x198   :  { %827 = vmatmul.bf16.gmra.mxu0 %v595_v9 }
 0x199   :  { %865 = vmatmul.bf16.gmra.mxu2 %v619_v35  ;;  %1280 = vmatpush.bf16.msrb.mxu0 %v2197_v37 }
 0x19a   :  { %1318 = vmatpush.bf16.msrb.mxu2 %v2192_v54  ;;  %1300 = vmatpush.bf16.msrb.mxu1 %v2202_v31 }
 0x19d   :  { %1281 = vmatpush.bf16.msrb.mxu0 %v2214_v28 }
 0x19e   :  { %1319 = vmatpush.bf16.msrb.mxu2 %v2209_v60  ;;  %1301 = vmatpush.bf16.msrb.mxu1 %v2220_v21 }
 0x1a1   :  { %1282 = vmatpush.bf16.msrb.mxu0 %v2232_v63 }
 0x1a2   :  { %1320 = vmatpush.bf16.msrb.mxu2 %v2227_v3  ;;  %1302 = vmatpush.bf16.msrb.mxu1 %v2238_v12 }
 0x1a5   :  { %1283 = vmatpush.bf16.msrb.mxu0 %v2251_v58 }
 0x1a6   :  { %1321 = vmatpush.bf16.msrb.mxu2 %v2246_v62 }
 0x201   :  { %v842_v37 = vpop.f32.mrf.mxu1 }
 0x205   :  { %v823_v54 = vpop.f32.mrf.mxu0 }
 0x206   :  { %v843_v49 = vadd.f32 %v842_v37, %v823_v54 }
 0x209   :  { %v844_v40 = vpop.f32.mrf.mxu1 }
 0x20c   :  { %v861_v39 = vpop.f32.mrf.mxu2 }
 0x20d   :  { %v825_v31 = vpop.f32.mrf.mxu0  ;;  %v2331_v22 = vadd.f32 %v861_v39, %v843_v49 }
 0x20e   :  { %v845_v46 = vadd.f32 %v844_v40, %v825_v31 }
 0x20f   :  { %v880_v32 = vmul.f32 %v2331_v22, %v2331_v22 }
 0x211   :  { %v847_v45 = vpop.f32.mrf.mxu1 }
 0x214   :  { %v863_v28 = vpop.f32.mrf.mxu2 }
 0x215   :  { %v828_v41 = vpop.f32.mrf.mxu0  ;;  %v2329_v63 = vadd.f32 %v863_v28, %v845_v46 }
 0x216   :  { %v848_v3 = vadd.f32 %v847_v45, %v828_v41 }
 0x217   :  { %v881_v62 = vmul.f32 %v2329_v63, %v2329_v63  ;;  %v871_v10 = vadd.f32 %v2329_v63, %v2331_v22 }
 0x219   :  { %v849_v12 = vpop.f32.mrf.mxu1  ;;  %v884_v51 = vadd.f32 %v881_v62, %v880_v32 }
 0x21c   :  { %v866_v21 = vpop.f32.mrf.mxu2 }
 0x21d   :  { %v2333_v60 = vadd.f32 %v866_v21, %v848_v3  ;;  %v830_v58 = vpop.f32.mrf.mxu0 }
 0x21e   :  { %v850_v8 = vadd.f32 %v849_v12, %v830_v58 }
 0x21f   :  { %v882_v44 = vmul.f32 %v2333_v60, %v2333_v60  ;;  %v872_v53 = vadd.f32 %v871_v10, %v2333_v60 }
 0x221   :  { %v885_v43 = vadd.f32 %v884_v51, %v882_v44  ;;  %v1671_v44 = vld [vmem:[%s2478_s5 + $0x1] ss:$0 sm:$0xff] }
 0x224   :  { %v868_v16 = vpop.f32.mrf.mxu2 }
 0x225   :  { %v2344_v47 = vadd.f32 %v868_v16, %v850_v8 }
 0x227   :  { %v873_v15 = vadd.f32 %v872_v53, %v2344_v47  ;;  %v883_v17 = vmul.f32 %v2344_v47, %v2344_v47 }
 0x229   :  { %v874_v52 = vrot.slane %v873_v15, 4  ;;  %v886_v56 = vadd.f32 %v885_v43, %v883_v17 }
 0x22b   :  { %v875_v57 = vadd.f32 %v874_v52, %v873_v15  ;;  %v887_v42 = vrot.slane %v886_v56, 4 }
 0x22d   :  { %v876_v50 = vrot.slane %v875_v57, 2  ;;  %v888_v11 = vadd.f32 %v887_v42, %v886_v56 }
 0x22f   :  { %v877_v24 = vadd.f32 %v876_v50, %v875_v57  ;;  %v889_v18 = vrot.slane %v888_v11, 2 }
 0x231   :  { %v878_v48 = vrot.slane %v877_v24, 1  ;;  %v890_v29 = vadd.f32 %v889_v18, %v888_v11 }
 0x233   :  { %v891_v7 = vrot.slane %v890_v29, 1  ;;  %v879_v55 = vadd.f32 %v878_v48, %v877_v24  ;;  %v1685_v24 = vld [vmem:[%s2477_s1 + $0x10] sm:$0xff]  ;;  %v1686_v48 = vld [vmem:[%s2477_s1] sm:$0xff] }
 0x235   :  { %v892_v59 = vadd.f32 %v891_v7, %v890_v29  ;;  %v1687_v7 = vld [vmem:[%s2477_s1 + $0x8] sm:$0xff] }
 0x237   :  { %v893_v23 = vsel %vm103_vm0, %v879_v55, %v892_v59 }
 0x238   :  { %910 = vmatmul.f32.vlgmr.msrb.gmra.mxu3 %v893_v23 }
 0x239   :  { %1356 = vmatpush.msrb.mxu3 %v1941_v14  ;;  %v2542_v14 = vld [vmem:[#allocation13_spill] sm:$0xff] }
 0x23b   :  { %1357 = vmatpush.msrb.mxu3 %v2532_v34 }
 0x23d   :  { %1358 = vmatpush.msrb.mxu3 %v2533_v26 }
 0x23f   :  { %1359 = vmatpush.msrb.mxu3 %v2534_v0 }
 0x241   :  { %1360 = vmatpush.msrb.mxu3 %v2535_v2 }
 0x243   :  { %1361 = vmatpush.msrb.mxu3 %v2536_v25 }
 0x245   :  { %1362 = vmatpush.msrb.mxu3 %v2537_v1  ;;  %v2547_v1 = vld [vmem:[#allocation2_spill] sm:$0xff] }
 0x247   :  { %1363 = vmatpush.msrb.mxu3 %v2538_v5 }
 0x249   :  { %1364 = vmatpush.msrb.mxu3 %v2539_v61 }
 0x24b   :  { %1365 = vmatpush.msrb.mxu3 %v2540_v20 }
 0x24d   :  { %1366 = vmatpush.msrb.mxu3 %v2541_v4 }
 0x24f   :  { %1367 = vmatpush.msrb.mxu3 %v2542_v14 }
 0x251   :  { %1368 = vmatpush.msrb.mxu3 %v2543_v6 }
 0x253   :  { %1369 = vmatpush.msrb.mxu3 %v2544_v33 }
 0x255   :  { %1370 = vmatpush.msrb.mxu3 %v2545_v38 }
 0x257   :  { %1371 = vmatpush.msrb.mxu3 %v2546_v36 }
 0x2bb   :  { %v911_v9 = vpop.f32.mrf.mxu3 }
 0x2bc   :  { %v914_v35 = vmul.f32 0.001953125, %v911_v9 }
 0x2be   :  { %v915_v37 = vmul.f32 %v914_v35, %v914_v35  ;;  %v920_v46 = vperm.slane %v914_v35, 0 }
 0x2c0   :  { %v917_v54 = vrot.slane %v915_v37, 7  ;;  %v921_v3 = vsub.f32 %v2331_v22, %v920_v46  ;;  %v922_v62 = vsub.f32 %v2329_v63, %v920_v46  ;;  %v923_v12 = vsub.f32 %v2333_v60, %v920_v46  ;;  %v1672_v22 = vld [vmem:[%s2481_s6 + $0x1] ss:$0 sm:$0xff] }
 0x2c1   :  { %v924_v32 = vsub.f32 %v2344_v47, %v920_v46 }
 0x2c2   :  { %v919_v39 = vsub.f32 %v914_v35, %v917_v54 }
 0x2c4   :  { %v925_v31 = vadd.f32 1e-05, %v919_v39 }
 0x2c6   :  { %1679 = vrsqrt.f32 %v925_v31  ;;  %vm932_vm10 = vweird.f32 %v925_v31 }
 0x2cc   :  { %v1680_v40 = vpop.eup %1679 }
 0x2cd   :  { %v927_v28 = vmul.f32 %v1680_v40, %v925_v31  ;;  %vm933_vm9 = vweird.f32 %v1680_v40 }
 0x2ce   :  { %vm934_vm11 = vmor %vm932_vm10, %vm933_vm9 }
 0x2cf   :  { %v928_v41 = vmul.f32 %v1680_v40, %v927_v28 }
 0x2d1   :  { %v929_v45 = vmul.f32 0.5, %v928_v41 }
 0x2d3   :  { %v930_v21 = vsub.f32 1.5, %v929_v45 }
 0x2d5   :  { %v931_v49 = vmul.f32 %v1680_v40, %v930_v21 }
 0x2d7   :  { %v935_v58 = vsel %vm934_vm11, %v1680_v40, %v931_v49 }
 0x2d8   :  { %v936_v10 = vperm.slane %v935_v58, 1 }
 0x2da   :  { %v937_v8 = vmul.f32 %v936_v10, %v921_v3  ;;  %v938_v16 = vmul.f32 %v936_v10, %v922_v62  ;;  %v939_v51 = vmul.f32 %v936_v10, %v923_v12  ;;  %v940_v53 = vmul.f32 %v936_v10, %v924_v32 }
 0x2dc   :  { %v942_v43 = vmul.f32 %v1671_v44, %v937_v8  ;;  %v943_v15 = vmul.f32 %v1671_v44, %v938_v16  ;;  %v944_v63 = vmul.f32 %v1671_v44, %v939_v51  ;;  %v945_v17 = vmul.f32 %v1671_v44, %v940_v53 }
 0x2de   :  { %v947_v60 = vadd.f32 %v1672_v22, %v942_v43  ;;  %v948_v52 = vadd.f32 %v1672_v22, %v943_v15  ;;  %v949_v47 = vadd.f32 %v1672_v22, %v944_v63  ;;  %v950_v56 = vadd.f32 %v1672_v22, %v945_v17 }
 0x2e0   :  { %v951_v57 = vmax.f32 %v947_v60, 0.0  ;;  %v952_v42 = vmax.f32 %v948_v52, 0.0  ;;  %v953_v50 = vmax.f32 %v949_v47, 0.0  ;;  %v954_v11 = vmax.f32 %v950_v56, 0.0 }
 0x2e2   :  { %v2379_v18 = vadd.f32 %v1685_v24, %v953_v50  ;;  %v2384_v29 = vadd.f32 %v1686_v48, %v951_v57  ;;  %v2389_v55 = vadd.f32 %v1687_v7, %v952_v42  ;;  %v2401_v5 = vadd.f32 %v954_v11, %v2547_v1 }
 0x2e4   :  { %v1003_v59 = vpack.c.bf16 %v2384_v29, %v2384_v29  ;;  %v1004_v23 = vpack.c.bf16 %v2389_v55, %v2389_v55  ;;  %v967_v34 = vrot.slane %v2384_v29, 7  ;;  %v968_v26 = vrot.slane %v2389_v55, 7 }
 0x2e5   :  { %v983_v0 = vrot.slane %v2384_v29, 1  ;;  %v984_v2 = vrot.slane %v2389_v55, 1  ;;  %v986_v25 = vrot.slane %v2379_v18, 1  ;;  %v970_v41 = vrot.slane %v2379_v18, 7 }
 0x2e6   :  { %v1027_v61 = vunpack.c.l.b16 %v1003_v59  ;;  %v1028_v20 = vunpack.c.l.b16 %v1004_v23  ;;  %v969_v4 = vsel %vm103_vm0, %v967_v34, %v968_v26  ;;  %v978_v14 = vsel %vm103_vm0, 0.0, %v967_v34 }
 0x2e7   :  { %v979_v6 = vsel %vm1831_vm2, 0.0, %v978_v14  ;;  %v1000_v33 = vpack.c.bf16 %v969_v4, %v969_v4  ;;  %v985_v38 = vsel %vm120_vm1, %v983_v0, %v984_v2  ;;  %v987_v36 = vsel %vm120_vm1, %v984_v2, %v986_v25  ;;  %v2548_v4 = vld [vmem:[#allocation18_spill] sm:$0xff] }
 0x2e8   :  { %v1031_v9 = vpack.c.b16 %v1028_v20, %v1027_v61  ;;  %v999_v35 = vpack.c.bf16 %v979_v6, %v979_v6  ;;  %v996_v37 = vsel %vm1836_vm3, 0.0, %v987_v36  ;;  %v1007_v54 = vpack.c.bf16 %v985_v38, %v985_v38  ;;  %v2550_v36 = vld [vmem:[#allocation20_spill] sm:$0xff] }
 0x2e9   :  { %v1016_v39 = vunpack.c.l.b16 %v1000_v33  ;;  %v1008_v31 = vpack.c.bf16 %v996_v37, %v996_v37  ;;  %v988_v46 = vrot.slane %v2401_v5, 1  ;;  %v972_v3 = vrot.slane %v2401_v5, 7  ;;  %v2549_v33 = vld [vmem:[#allocation19_spill] sm:$0xff] }
 0x2ea   :  { %1074 = vmatmul.bf16.vlgmr.msra.gmra.mxu1 %v1031_v9  ;;  %v1015_v40 = vunpack.c.l.b16 %v999_v35  ;;  %v1039_v28 = vunpack.c.l.b16 %v1007_v54  ;;  %v971_v58 = vsel %vm103_vm0, %v968_v26, %v970_v41  ;;  %v1005_v12 = vpack.c.bf16 %v2379_v18, %v2379_v18 }
 0x2eb   :  { %v1040_v45 = vunpack.c.l.b16 %v1008_v31  ;;  %v994_v62 = vsel %vm120_vm1, %v988_v46, 0.0  ;;  %v1006_v32 = vpack.c.bf16 %v2401_v5, %v2401_v5  ;;  %v973_v10 = vsel %vm103_vm0, %v970_v41, %v972_v3 }
 0x2ec   :  { %v1019_v21 = vpack.c.b16 %v1016_v39, %v1015_v40  ;;  %v981_v44 = vsel %vm1916_vm4, 0.0, %v971_v58  ;;  %v989_v8 = vsel %vm120_vm1, %v986_v25, %v988_v46  ;;  %v998_v16 = vsel %vm1921_vm5, 0.0, %v994_v62 }
 0x2ed   :  { %v1043_v49 = vpack.c.b16 %v1040_v45, %v1039_v28  ;;  %v1029_v51 = vunpack.c.l.b16 %v1005_v12  ;;  %v1030_v53 = vunpack.c.l.b16 %v1006_v32  ;;  %v1001_v22 = vpack.c.bf16 %v981_v44, %v981_v44 }
 0x2ee   :  { %1055 = vmatmul.bf16.vlgmr.msra.gmra.mxu0 %v1019_v21  ;;  %v1002_v43 = vpack.c.bf16 %v973_v10, %v973_v10  ;;  %v1009_v15 = vpack.c.bf16 %v989_v8, %v989_v8  ;;  %v1010_v63 = vpack.c.bf16 %v998_v16, %v998_v16  ;;  %v2551_v21 = vld [vmem:[#allocation21_spill] sm:$0xff] }
 0x2ef   :  { %1093 = vmatmul.bf16.vlgmr.msra.gmra.mxu2 %v1043_v49  ;;  %v1032_v17 = vpack.c.b16 %v1030_v53, %v1029_v51  ;;  %v1017_v60 = vunpack.c.l.b16 %v1001_v22 }
 0x2f0   :  { %v1018_v52 = vunpack.c.l.b16 %v1002_v43  ;;  %v1041_v47 = vunpack.c.l.b16 %v1009_v15  ;;  %v1042_v56 = vunpack.c.l.b16 %v1010_v63 }
 0x2f2   :  { %v1020_v57 = vpack.c.b16 %v1018_v52, %v1017_v60  ;;  %v1044_v42 = vpack.c.b16 %v1042_v56, %v1041_v47 }
 0x2fa   :  { %1079 = vmatmul.bf16.gmra.mxu1 %v1032_v17 }
 0x2fe   :  { %1060 = vmatmul.bf16.gmra.mxu0 %v1020_v57 }
 0x2ff   :  { %1098 = vmatmul.bf16.gmra.mxu2 %v1044_v42 }
 0x367   :  { %v1075_v50 = vpop.f32.mrf.mxu1 }
 0x36b   :  { %v1056_v11 = vpop.f32.mrf.mxu0 }
 0x36c   :  { %v1076_v0 = vadd.f32 %v1075_v50, %v1056_v11 }
 0x36f   :  { %v1077_v7 = vpop.f32.mrf.mxu1 }
 0x372   :  { %v1094_v24 = vpop.f32.mrf.mxu2 }
 0x373   :  { %v1058_v48 = vpop.f32.mrf.mxu0  ;;  %v1095_v61 = vadd.f32 %v1094_v24, %v1076_v0 }
 0x374   :  { %v1078_v26 = vadd.f32 %v1077_v7, %v1058_v48 }
 0x375   :  { %v1104_v38 = vsub.f32 %v2549_v33, %v1095_v61 }
 0x377   :  { %v1080_v34 = vpop.f32.mrf.mxu1  ;;  %v1117_v31 = vmul.f32 %v1104_v38, %v1104_v38 }
 0x37a   :  { %v1096_v59 = vpop.f32.mrf.mxu2 }
 0x37b   :  { %v1061_v23 = vpop.f32.mrf.mxu0  ;;  %v1097_v2 = vadd.f32 %v1096_v59, %v1078_v26 }
 0x37c   :  { %v1081_v25 = vadd.f32 %v1080_v34, %v1061_v23 }
 0x37d   :  { %v1105_v14 = vsub.f32 %v2548_v4, %v1097_v2 }
 0x37f   :  { %v1082_v35 = vpop.f32.mrf.mxu1  ;;  %v1118_v37 = vmul.f32 %v1105_v14, %v1105_v14  ;;  %v1108_v40 = vadd.f32 %v1105_v14, %v1104_v38 }
 0x381   :  { %v1121_v45 = vadd.f32 %v1118_v37, %v1117_v31 }
 0x382   :  { %v1099_v1 = vpop.f32.mrf.mxu2 }
 0x383   :  { %v1100_v20 = vadd.f32 %v1099_v1, %v1081_v25  ;;  %v1063_v6 = vpop.f32.mrf.mxu0 }
 0x384   :  { %v1083_v54 = vadd.f32 %v1082_v35, %v1063_v6 }
 0x385   :  { %v1106_v9 = vsub.f32 %v2550_v36, %v1100_v20  ;;  %v1673_v20 = vld [vmem:[%s2478_s5 + $0x2] ss:$0 sm:$0xff] }
 0x386   :  { %v1674_v36 = vld [vmem:[%s2481_s6 + $0x2] ss:$0 sm:$0xff] }
 0x387   :  { %v1119_v28 = vmul.f32 %v1106_v9, %v1106_v9  ;;  %v1109_v46 = vadd.f32 %v1108_v40, %v1106_v9 }
 0x389   :  { %v1122_v3 = vadd.f32 %v1121_v45, %v1119_v28 }
 0x38a   :  { %v1101_v39 = vpop.f32.mrf.mxu2 }
 0x38b   :  { %v1102_v41 = vadd.f32 %v1101_v39, %v1083_v54 }
 0x38d   :  { %v1107_v49 = vsub.f32 %v2551_v21, %v1102_v41 }
 0x38f   :  { %v1110_v58 = vadd.f32 %v1109_v46, %v1107_v49  ;;  %v1120_v62 = vmul.f32 %v1107_v49, %v1107_v49 }
 0x391   :  { %v1111_v12 = vrot.slane %v1110_v58, 4  ;;  %v1123_v32 = vadd.f32 %v1122_v3, %v1120_v62 }
 0x393   :  { %v1112_v10 = vadd.f32 %v1111_v12, %v1110_v58  ;;  %v1124_v44 = vrot.slane %v1123_v32, 4 }
 0x395   :  { %v1113_v8 = vrot.slane %v1112_v10, 2  ;;  %v1125_v16 = vadd.f32 %v1124_v44, %v1123_v32 }
 0x397   :  { %v1114_v51 = vadd.f32 %v1113_v8, %v1112_v10  ;;  %v1126_v53 = vrot.slane %v1125_v16, 2 }
 0x399   :  { %v1115_v22 = vrot.slane %v1114_v51, 1  ;;  %v1127_v43 = vadd.f32 %v1126_v53, %v1125_v16 }
 0x39b   :  { %v1128_v15 = vrot.slane %v1127_v43, 1  ;;  %v1116_v63 = vadd.f32 %v1115_v22, %v1114_v51 }
 0x39d   :  { %v1129_v17 = vadd.f32 %v1128_v15, %v1127_v43 }
 0x39f   :  { %v1130_v60 = vsel %vm103_vm0, %v1116_v63, %v1129_v17 }
 0x3a0   :  { %1147 = vmatmul.f32.vlgmr.msra.gmra.mxu3 %v1130_v60 }
 0x423   :  { %v1148_v52 = vpop.f32.mrf.mxu3 }
 0x424   :  { %v1151_v47 = vmul.f32 0.001953125, %v1148_v52 }
 0x426   :  { %v1152_v56 = vmul.f32 %v1151_v47, %v1151_v47  ;;  %v1157_v59 = vperm.slane %v1151_v47, 0 }
 0x428   :  { %v1154_v57 = vrot.slane %v1152_v56, 7  ;;  %v1158_v26 = vsub.f32 %v1104_v38, %v1157_v59  ;;  %v1159_v2 = vsub.f32 %v1105_v14, %v1157_v59  ;;  %v1160_v25 = vsub.f32 %v1106_v9, %v1157_v59 }
 0x429   :  { %v1161_v1 = vsub.f32 %v1107_v49, %v1157_v59 }
 0x42a   :  { %v1156_v42 = vsub.f32 %v1151_v47, %v1154_v57 }
 0x42c   :  { %v1162_v50 = vadd.f32 1e-05, %v1156_v42 }
 0x42e   :  { %1681 = vrsqrt.f32 %v1162_v50  ;;  %vm1169_vm13 = vweird.f32 %v1162_v50 }
 0x434   :  { %v1682_v11 = vpop.eup %1681 }
 0x435   :  { %v1164_v24 = vmul.f32 %v1682_v11, %v1162_v50  ;;  %vm1170_vm12 = vweird.f32 %v1682_v11 }
 0x436   :  { %vm1171_vm14 = vmor %vm1169_vm13, %vm1170_vm12 }
 0x437   :  { %v1165_v48 = vmul.f32 %v1682_v11, %v1164_v24 }
 0x439   :  { %v1166_v7 = vmul.f32 0.5, %v1165_v48 }
 0x43b   :  { %v1167_v23 = vsub.f32 1.5, %v1166_v7 }
 0x43d   :  { %v1168_v34 = vmul.f32 %v1682_v11, %v1167_v23 }
 0x43f   :  { %v1172_v0 = vsel %vm1171_vm14, %v1682_v11, %v1168_v34 }
 0x440   :  { %v1173_v61 = vperm.slane %v1172_v0, 1 }
 0x442   :  { %v1174_v4 = vmul.f32 %v1173_v61, %v1158_v26  ;;  %v1175_v6 = vmul.f32 %v1173_v61, %v1159_v2  ;;  %v1176_v33 = vmul.f32 %v1173_v61, %v1160_v25  ;;  %v1177_v35 = vmul.f32 %v1173_v61, %v1161_v1 }
 0x444   :  { %v1181_v37 = vmul.f32 %v1673_v20, %v1176_v33  ;;  %v1179_v54 = vmul.f32 %v1673_v20, %v1174_v4  ;;  %v1180_v38 = vmul.f32 %v1673_v20, %v1175_v6  ;;  %v1182_v39 = vmul.f32 %v1673_v20, %v1177_v35 }
 0x446   :  { %v1186_v14 = vadd.f32 %v1674_v36, %v1181_v37  ;;  %v1184_v9 = vadd.f32 %v1674_v36, %v1179_v54  ;;  %v1185_v31 = vadd.f32 %v1674_v36, %v1180_v38  ;;  %v1187_v40 = vadd.f32 %v1674_v36, %v1182_v39 }
 0x448   :  { %v1190_v28 = vmax.f32 %v1186_v14, 0.0  ;;  %v1188_v41 = vmax.f32 %v1184_v9, 0.0  ;;  %v1189_v45 = vmax.f32 %v1185_v31, 0.0  ;;  %v1191_v32 = vmax.f32 %v1187_v40, 0.0 }
 0x44a   :  { %v1232_v46 = vpack.c.bf16 %v1188_v41, %v1188_v41  ;;  %v1233_v21 = vpack.c.bf16 %v1189_v45, %v1189_v45  ;;  %v1196_v49 = vrot.slane %v1188_v41, 7  ;;  %v1197_v3 = vrot.slane %v1189_v45, 7 }
 0x44b   :  { %v1212_v58 = vrot.slane %v1188_v41, 1  ;;  %v1213_v62 = vrot.slane %v1189_v45, 1  ;;  %v1215_v12 = vrot.slane %v1190_v28, 1  ;;  %v1199_v42 = vrot.slane %v1190_v28, 7 }
 0x44c   :  { %v1256_v10 = vunpack.c.l.b16 %v1232_v46  ;;  %v1257_v44 = vunpack.c.l.b16 %v1233_v21  ;;  %v1198_v8 = vsel %vm103_vm0, %v1196_v49, %v1197_v3  ;;  %v1207_v16 = vsel %vm103_vm0, 0.0, %v1196_v49 }
 0x44d   :  { %v1208_v51 = vsel %vm1831_vm2, 0.0, %v1207_v16  ;;  %v1229_v53 = vpack.c.bf16 %v1198_v8, %v1198_v8  ;;  %v1214_v22 = vsel %vm120_vm1, %v1212_v58, %v1213_v62  ;;  %v1216_v43 = vsel %vm120_vm1, %v1213_v62, %v1215_v12 }
 0x44e   :  { %v1260_v15 = vpack.c.b16 %v1257_v44, %v1256_v10  ;;  %v1228_v63 = vpack.c.bf16 %v1208_v51, %v1208_v51  ;;  %v1225_v17 = vsel %vm1836_vm3, 0.0, %v1216_v43  ;;  %v1236_v60 = vpack.c.bf16 %v1214_v22, %v1214_v22 }
 0x44f   :  { %v1245_v52 = vunpack.c.l.b16 %v1229_v53  ;;  %v1237_v47 = vpack.c.bf16 %v1225_v17, %v1225_v17  ;;  %v1217_v27 = vrot.slane %v1191_v32, 1  ;;  %v1201_v48 = vrot.slane %v1191_v32, 7 }
 0x450   :  { %1303 = vmatmul.bf16.vlgmr.msrb.gmra.mxu1 %v1260_v15  ;;  %v1244_v56 = vunpack.c.l.b16 %v1228_v63  ;;  %v1268_v57 = vunpack.c.l.b16 %v1236_v60  ;;  %v1200_v7 = vsel %vm103_vm0, %v1197_v3, %v1199_v42  ;;  %v1234_v30 = vpack.c.bf16 %v1190_v28, %v1190_v28 }
 0x451   :  { %v1269_v50 = vunpack.c.l.b16 %v1237_v47  ;;  %v1223_v59 = vsel %vm120_vm1, %v1217_v27, 0.0  ;;  %v1235_v23 = vpack.c.bf16 %v1191_v32, %v1191_v32  ;;  %v1202_v34 = vsel %vm103_vm0, %v1199_v42, %v1201_v48 }
 0x452   :  { %v1248_v11 = vpack.c.b16 %v1245_v52, %v1244_v56  ;;  %v1210_v26 = vsel %vm1916_vm4, 0.0, %v1200_v7  ;;  %v1218_v0 = vsel %vm120_vm1, %v1215_v12, %v1217_v27  ;;  %v1227_v2 = vsel %vm1921_vm5, 0.0, %v1223_v59 }
 0x453   :  { %v1272_v24 = vpack.c.b16 %v1269_v50, %v1268_v57  ;;  %v1258_v25 = vunpack.c.l.b16 %v1234_v30  ;;  %v1259_v1 = vunpack.c.l.b16 %v1235_v23  ;;  %v1230_v61 = vpack.c.bf16 %v1210_v26, %v1210_v26 }
 0x454   :  { %1284 = vmatmul.bf16.vlgmr.msrb.gmra.mxu0 %v1248_v11  ;;  %v1231_v20 = vpack.c.bf16 %v1202_v34, %v1202_v34  ;;  %v1238_v4 = vpack.c.bf16 %v1218_v0, %v1218_v0  ;;  %v1239_v6 = vpack.c.bf16 %v1227_v2, %v1227_v2 }
 0x455   :  { %1322 = vmatmul.bf16.vlgmr.msrb.gmra.mxu2 %v1272_v24  ;;  %v1261_v33 = vpack.c.b16 %v1259_v1, %v1258_v25  ;;  %v1246_v36 = vunpack.c.l.b16 %v1230_v61 }
 0x456   :  { %v1247_v35 = vunpack.c.l.b16 %v1231_v20  ;;  %v1270_v37 = vunpack.c.l.b16 %v1238_v4  ;;  %v1271_v54 = vunpack.c.l.b16 %v1239_v6 }
 0x458   :  { %v1249_v38 = vpack.c.b16 %v1247_v35, %v1246_v36  ;;  %v1273_v13 = vpack.c.b16 %v1271_v54, %v1270_v37 }
 0x460   :  { %1308 = vmatmul.bf16.gmra.mxu1 %v1261_v33 }
 0x464   :  { %1289 = vmatmul.bf16.gmra.mxu0 %v1249_v38 }
 0x465   :  { %1327 = vmatmul.bf16.gmra.mxu2 %v1273_v13 }
 0x4cd   :  { %v1304_v39 = vpop.f32.mrf.mxu1 }
 0x4d1   :  { %v1285_v14 = vpop.f32.mrf.mxu0 }
 0x4d2   :  { %v1305_v21 = vadd.f32 %v1304_v39, %v1285_v14 }
 0x4d5   :  { %v1306_v31 = vpop.f32.mrf.mxu1 }
 0x4d8   :  { %v1323_v19 = vpop.f32.mrf.mxu2 }
 0x4d9   :  { %v1287_v9 = vpop.f32.mrf.mxu0  ;;  %v1324_v58 = vadd.f32 %v1323_v19, %v1305_v21  ;;  %v1675_v19 = vld [vmem:[%s2478_s5 + $0x3] ss:$0 sm:$0xff] }
 0x4da   :  { %v1307_v45 = vadd.f32 %v1306_v31, %v1287_v9 }
 0x4db   :  { %v1342_v44 = vmul.f32 %v1324_v58, %v1324_v58 }
 0x4dd   :  { %v1309_v41 = vpop.f32.mrf.mxu1 }
 0x4e0   :  { %v1325_v40 = vpop.f32.mrf.mxu2 }
 0x4e1   :  { %v1290_v28 = vpop.f32.mrf.mxu0  ;;  %v1326_v49 = vadd.f32 %v1325_v40, %v1307_v45 }
 0x4e2   :  { %v1310_v3 = vadd.f32 %v1309_v41, %v1290_v28  ;;  %v1676_v41 = vld [vmem:[%s2481_s6 + $0x3] ss:$0 sm:$0xff] }
 0x4e3   :  { %v1343_v32 = vmul.f32 %v1326_v49, %v1326_v49  ;;  %v1333_v8 = vadd.f32 %v1326_v49, %v1324_v58 }
 0x4e5   :  { %v1311_v10 = vpop.f32.mrf.mxu1  ;;  %v1346_v22 = vadd.f32 %v1343_v32, %v1342_v44 }
 0x4e8   :  { %v1328_v46 = vpop.f32.mrf.mxu2 }
 0x4e9   :  { %v1329_v62 = vadd.f32 %v1328_v46, %v1310_v3  ;;  %v1292_v12 = vpop.f32.mrf.mxu0 }
 0x4ea   :  { %v1312_v51 = vadd.f32 %v1311_v10, %v1292_v12 }
 0x4eb   :  { %v1344_v16 = vmul.f32 %v1329_v62, %v1329_v62  ;;  %v1334_v43 = vadd.f32 %v1333_v8, %v1329_v62 }
 0x4ed   :  { %v1347_v63 = vadd.f32 %v1346_v22, %v1344_v16 }
 0x4f0   :  { %v1330_v53 = vpop.f32.mrf.mxu2 }
 0x4f1   :  { %v1331_v15 = vadd.f32 %v1330_v53, %v1312_v51 }
 0x4f3   :  { %v1335_v17 = vadd.f32 %v1334_v43, %v1331_v15  ;;  %v1345_v60 = vmul.f32 %v1331_v15, %v1331_v15 }
 0x4f5   :  { %v1336_v52 = vrot.slane %v1335_v17, 4  ;;  %v1348_v47 = vadd.f32 %v1347_v63, %v1345_v60 }
 0x4f7   :  { %v1337_v56 = vadd.f32 %v1336_v52, %v1335_v17  ;;  %v1349_v57 = vrot.slane %v1348_v47, 4 }
 0x4f9   :  { %v1338_v42 = vrot.slane %v1337_v56, 2  ;;  %v1350_v50 = vadd.f32 %v1349_v57, %v1348_v47 }
 0x4fb   :  { %v1339_v27 = vadd.f32 %v1338_v42, %v1337_v56  ;;  %v1351_v11 = vrot.slane %v1350_v50, 2 }
 0x4fd   :  { %v1340_v24 = vrot.slane %v1339_v27, 1  ;;  %v1352_v48 = vadd.f32 %v1351_v11, %v1350_v50 }
 0x4ff   :  { %v1353_v7 = vrot.slane %v1352_v48, 1  ;;  %v1341_v59 = vadd.f32 %v1340_v24, %v1339_v27 }
 0x501   :  { %v1354_v30 = vadd.f32 %v1353_v7, %v1352_v48 }
 0x503   :  { %v1355_v23 = vsel %vm103_vm0, %v1341_v59, %v1354_v30 }
 0x504   :  { %1372 = vmatmul.f32.vlgmr.msrb.gmra.mxu3 %v1355_v23 }
 0x587   :  { %v1373_v34 = vpop.f32.mrf.mxu3 }
 0x588   :  { %v1376_v26 = vmul.f32 0.001953125, %v1373_v34 }
 0x58a   :  { %v1377_v0 = vmul.f32 %v1376_v26, %v1376_v26  ;;  %v1382_v33 = vperm.slane %v1376_v26, 0 }
 0x58c   :  { %v1379_v2 = vrot.slane %v1377_v0, 7  ;;  %v1383_v37 = vsub.f32 %v1324_v58, %v1382_v33  ;;  %v1384_v38 = vsub.f32 %v1326_v49, %v1382_v33  ;;  %v1385_v13 = vsub.f32 %v1329_v62, %v1382_v33 }
 0x58d   :  { %v1386_v39 = vsub.f32 %v1331_v15, %v1382_v33 }
 0x58e   :  { %v1381_v25 = vsub.f32 %v1376_v26, %v1379_v2 }
 0x590   :  { %v1387_v1 = vadd.f32 1e-05, %v1381_v25 }
 0x592   :  { %1683 = vrsqrt.f32 %v1387_v1  ;;  %vm1394_vm1 = vweird.f32 %v1387_v1 }
 0x598   :  { %v1684_v61 = vpop.eup %1683 }
 0x599   :  { %v1389_v20 = vmul.f32 %v1684_v61, %v1387_v1  ;;  %vm1395_vm15 = vweird.f32 %v1684_v61 }
 0x59a   :  { %vm1396_vm2 = vmor %vm1394_vm1, %vm1395_vm15 }
 0x59b   :  { %v1390_v4 = vmul.f32 %v1684_v61, %v1389_v20 }
 0x59d   :  { %v1391_v6 = vmul.f32 0.5, %v1390_v4 }
 0x59f   :  { %v1392_v36 = vsub.f32 1.5, %v1391_v6 }
 0x5a1   :  { %v1393_v35 = vmul.f32 %v1684_v61, %v1392_v36 }
 0x5a3   :  { %v1397_v54 = vsel %vm1396_vm2, %v1684_v61, %v1393_v35 }
 0x5a4   :  { %v1398_v14 = vperm.slane %v1397_v54, 1 }
 0x5a6   :  { %v1399_v9 = vmul.f32 %v1398_v14, %v1383_v37  ;;  %v1400_v31 = vmul.f32 %v1398_v14, %v1384_v38  ;;  %v1401_v40 = vmul.f32 %v1398_v14, %v1385_v13  ;;  %v1402_v28 = vmul.f32 %v1398_v14, %v1386_v39 }
 0x5a8   :  { %v1404_v45 = vmul.f32 %v1675_v19, %v1399_v9  ;;  %v1405_v46 = vmul.f32 %v1675_v19, %v1400_v31  ;;  %v1406_v21 = vmul.f32 %v1675_v19, %v1401_v40  ;;  %v1407_v3 = vmul.f32 %v1675_v19, %v1402_v28 }
 0x5aa   :  { %v1409_v49 = vadd.f32 %v1676_v41, %v1404_v45  ;;  %v1410_v58 = vadd.f32 %v1676_v41, %v1405_v46  ;;  %v1411_v62 = vadd.f32 %v1676_v41, %v1406_v21  ;;  %v1412_v12 = vadd.f32 %v1676_v41, %v1407_v3 }
 0x5ac   :  { %v1413_v32 = vmax.f32 %v1409_v49, 0.0  ;;  %v1414_v10 = vmax.f32 %v1410_v58, 0.0  ;;  %v1415_v44 = vmax.f32 %v1411_v62, 0.0  ;;  %v1416_v8 = vmax.f32 %v1412_v12, 0.0 }
 0x5ae   :  { %v1417_v16 = vadd.f32 %v1413_v32, %v2384_v29  ;;  %v1418_v51 = vadd.f32 %v1414_v10, %v2389_v55  ;;  %v1419_v53 = vadd.f32 %v1415_v44, %v2379_v18  ;;  %v1420_v22 = vadd.f32 %v1416_v8, %v2401_v5 }
 0x5b0   :  { %1421 = vst [vmem:[%s2483_s7] sm:$0xff] %v1417_v16 }
 0x5b1   :  { %1422 = vst [vmem:[%s2483_s7 + $0x8] sm:$0xff] %v1418_v51 }
 0x5b2   :  { %1423 = vst [vmem:[%s2483_s7 + $0x10] sm:$0xff] %v1419_v53 }
 0x5b3   :  { %1424 = vst [vmem:[%s2483_s7 + $0x18] sm:$0xff] %v1420_v22 }

</bundles_post_ra>
